<compile_context>
chip_gen: v5e
topology: v5e:2x2
jax: 0.10.0
libtpu: 0.0.40
codegen_flags: <defaults>
</compile_context>

<pallas_src>
import functools

import jax
import jax.numpy as jnp
from jax import lax
from jax.experimental import pallas as pl
from jax.experimental.pallas import tpu as pltpu

N_LAYERS = 4
_EPS = 1e-8  # matches torch F.cosine_similarity default eps
_INV_EPS = 1.0 / _EPS

# Scoped-VMEM budget: above the 32 MiB default, below v7x's 64 MiB physical.
_VMEM_LIMIT = 48 * 1024 * 1024


# ----------------------------------------------------------------------------
# Item MLP: tanh(item_fea @ W + b), row-tiled.
# ----------------------------------------------------------------------------
def mlp_kernel(x_ref, w_ref, b_ref, o_ref):
    y = jnp.dot(x_ref[...], w_ref[...], preferred_element_type=jnp.float32)
    o_ref[...] = jnp.tanh(y + b_ref[...])


def item_mlp(item_fea, W, b, *, tm=512):
    n_item, fea = item_fea.shape
    d = W.shape[1]
    tm = min(tm, n_item)
    while n_item % tm != 0:  # fall back to a divisor of n_item
        tm //= 2
    assert tm % 8 == 0 or tm == n_item, "row tile must respect (8,128) layout"

    return pl.pallas_call(
        mlp_kernel,
        out_shape=jax.ShapeDtypeStruct((n_item, d), jnp.float32),
        grid=(n_item // tm,),
        in_specs=[
            pl.BlockSpec((tm, fea), lambda i: (i, 0)),
            pl.BlockSpec((fea, d), lambda i: (0, 0)),
            pl.BlockSpec((1, d), lambda i: (0, 0)),
        ],
        out_specs=pl.BlockSpec((tm, d), lambda i: (i, 0)),
        compiler_params=pltpu.CompilerParams(
            dimension_semantics=("parallel",),
            vmem_limit_bytes=_VMEM_LIMIT,
        ),
    )(item_fea, W, b.reshape(1, d))


# ----------------------------------------------------------------------------
# One GCN propagation layer with cosine re-weighting and running layer-sum.
# ----------------------------------------------------------------------------
def gcn_layer_kernel(adj_ref, cur_ref, ego_ref, ego_inv_ref, acc_in_ref,
                     newcur_ref, acc_out_ref, mm_acc):
    k = pl.program_id(1)

    @pl.when(k == 0)
    def _init():
        mm_acc[...] = jnp.zeros_like(mm_acc)

    # next += adj[i, k] @ cur[k]   (bf16 x bf16 on the MXU, f32 accumulation)
    mm_acc[...] += jnp.dot(
        adj_ref[...],
        cur_ref[...].astype(jnp.bfloat16),
        preferred_element_type=jnp.float32,
    )

    @pl.when(k == pl.num_programs(1) - 1)
    def _epilogue():
        nxt = mm_acc[...]                      # (TM, D) f32
        ego = ego_ref[...]                     # (TM, D) f32
        # cosine_similarity(next, ego): dot / (max(||next||,eps)*max(||ego||,eps))
        # 1/max(sqrt(s),eps) == min(rsqrt(s), 1/eps)  -> EUP, no division.
        dot = jnp.sum(nxt * ego, axis=-1, keepdims=True)
        nxt_sq = jnp.sum(nxt * nxt, axis=-1, keepdims=True)
        inv_nxt = jnp.minimum(lax.rsqrt(nxt_sq), _INV_EPS)
        w = dot * inv_nxt * ego_inv_ref[...]   # ego_inv hoisted (computed once)
        scaled = w * nxt
        newcur_ref[...] = scaled
        acc_out_ref[...] = acc_in_ref[...] + scaled


def gcn_layer(adj_bf16, cur, ego, ego_inv, acc, *, tm=256, tk=512):
    n, d = cur.shape
    tm = min(tm, n)
    tk = min(tk, n)
    if n % tm != 0:
        tm = n
    if n % tk != 0:
        tk = n
    assert (tm % 8 == 0 or tm == n) and (tk % 128 == 0 or tk == n), \
        "adj tile must respect the (8,128) layout constraint"

    grid = (n // tm, n // tk)   # reduction (k) axis LAST
    new_cur, new_acc = pl.pallas_call(
        gcn_layer_kernel,
        out_shape=(
            jax.ShapeDtypeStruct((n, d), jnp.float32),   # new cur
            jax.ShapeDtypeStruct((n, d), jnp.float32),   # updated layer-sum
        ),
        grid_spec=pltpu.PrefetchScalarGridSpec(
            num_scalar_prefetch=0,
            grid=grid,
            in_specs=[
                pl.BlockSpec((tm, tk), lambda i, k: (i, k)),   # adj tile (bf16)
                pl.BlockSpec((tk, d), lambda i, k: (k, 0)),    # cur rows (k-step)
                pl.BlockSpec((tm, d), lambda i, k: (i, 0)),    # ego rows (epilogue)
                pl.BlockSpec((tm, 1), lambda i, k: (i, 0)),    # 1/max(||ego||,eps)
                pl.BlockSpec((tm, d), lambda i, k: (i, 0)),    # acc_in (aliased)
            ],
            out_specs=(
                pl.BlockSpec((tm, d), lambda i, k: (i, 0)),
                pl.BlockSpec((tm, d), lambda i, k: (i, 0)),
            ),
            scratch_shapes=[pltpu.VMEM((tm, d), jnp.float32)],
        ),
        compiler_params=pltpu.CompilerParams(
            # row tiles shard across v7x's 2 TensorCores; no-op on v5e/v6e.
            dimension_semantics=("parallel", "arbitrary"),
            vmem_limit_bytes=_VMEM_LIMIT,
        ),
        # acc is accumulated in place: no re-init, no extra HBM add op.
        input_output_aliases={4: 1},
    )(adj_bf16, cur, ego, ego_inv, acc)
    return new_cur, new_acc


# ----------------------------------------------------------------------------
# Full forward pass.
# ----------------------------------------------------------------------------
def layergcn_forward(adj, user_fea, item_fea, prompt_embedding, W, b,
                     num_user, num_item, *, mlp_tm=512, prop_tm=256,
                     prop_tk=512):
    del num_item  # only needed for the split, which is implied by num_user
    # prompt_embd = sum(prompt_embedding, 0); user_embd = user_fea + prompt_embd
    prompt_sum = jnp.sum(prompt_embedding, axis=0)
    user_embd = user_fea + prompt_sum[None, :]
    # item_embd = mlp(item_fea)    (Pallas, row-tiled)
    item_embd = item_mlp(item_fea, W, b, tm=mlp_tm)
    # ego = cat(user, item)
    ego = jnp.concatenate([user_embd, item_embd], axis=0).astype(jnp.float32)

    # Hoisted once per row (not per layer / per k-step): 1 / max(||ego||, eps)
    ego_inv = jnp.minimum(
        lax.rsqrt(jnp.sum(ego * ego, axis=-1, keepdims=True)), _INV_EPS)

    # Halve the dominant HBM stream: adj is read 4x (once per layer) in bf16.
    adj_bf16 = adj.astype(jnp.bfloat16)

    cur = ego
    acc = jnp.zeros_like(ego)        # running sum of layers 1..4 (in-kernel)
    for _ in range(N_LAYERS):
        cur, acc = gcn_layer(adj_bf16, cur, ego, ego_inv, acc,
                             tm=prop_tm, tk=prop_tk)

    ui_all = ego + acc               # + embeddings_layers[0]
    return ui_all[:num_user], ui_all[num_user:]


# ----------------------------------------------------------------------------
# References.
# ----------------------------------------------------------------------------
def _reference_f32(adj, user_fea, item_fea, prompt_embedding, W, b, num_user):
    """Pure-f32 PyTorch-semantics reference."""
    hp = lax.Precision.HIGHEST
    prompt_sum = jnp.sum(prompt_embedding, axis=0)
    user_embd = user_fea + prompt_sum[None, :]
    item_embd = jnp.tanh(jnp.dot(item_fea, W, precision=hp) + b[None, :])
    ego = jnp.concatenate([user_embd, item_embd], axis=0)
    ego_norm = jnp.maximum(jnp.linalg.norm(ego, axis=-1), _EPS)
    cur = ego
    acc = ego
    for _ in range(N_LAYERS):
        cur = jnp.dot(adj, cur, precision=hp)
        cur_norm = jnp.maximum(jnp.linalg.norm(cur, axis=-1), _EPS)
        w = jnp.sum(cur * ego, axis=-1) / (cur_norm * ego_norm)
        cur = w[:, None] * cur
        acc = acc + cur
    return acc[:num_user], acc[num_user:]


def _reference_kernel_precision(adj, user_fea, item_fea, prompt_embedding, W,
                                b, num_user):
    """Mimics the kernel's bf16 adj / bf16 cur MXU inputs (f32 accumulation)."""
    hp = lax.Precision.HIGHEST
    prompt_sum = jnp.sum(prompt_embedding, axis=0)
    user_embd = user_fea + prompt_sum[None, :]
    item_embd = jnp.tanh(jnp.dot(item_fea, W, precision=hp) + b[None, :])
    ego = jnp.concatenate([user_embd, item_embd], axis=0)
    ego_inv = jnp.minimum(
        lax.rsqrt(jnp.sum(ego * ego, axis=-1, keepdims=True)), _INV_EPS)
    adj_b = adj.astype(jnp.bfloat16).astype(jnp.float32)
    cur = ego
    acc = jnp.zeros_like(ego)
    for _ in range(N_LAYERS):
        cur_b = cur.astype(jnp.bfloat16).astype(jnp.float32)
        nxt = jnp.dot(adj_b, cur_b, precision=hp)
        inv_nxt = jnp.minimum(
            lax.rsqrt(jnp.sum(nxt * nxt, axis=-1, keepdims=True)), _INV_EPS)
        w = jnp.sum(nxt * ego, axis=-1, keepdims=True) * inv_nxt * ego_inv
        cur = w * nxt
        acc = acc + cur
    ui = ego + acc
    return ui[:num_user], ui[num_user:]


if __name__ == "__main__":
    # Small shapes; N = 256 gives a (2, 2) propagate grid with tm = tk = 128
    # so both the parallel row axis and the reduction axis are exercised.
    num_user, num_item = 64, 192
    emb_size = 32
    item_fea_dim = 16
    n_prompt = 4
    N = num_user + num_item

    key = jax.random.PRNGKey(0)
    k0, k1, k2, k3, k4 = jax.random.split(key, 5)

    user_fea = jax.random.normal(k0, (num_user, emb_size), jnp.float32)
    item_fea = jax.random.normal(k1, (num_item, item_fea_dim), jnp.float32)
    prompt_embedding = jax.random.normal(k2, (n_prompt, emb_size), jnp.float32)
    # Deterministic synthetic MLP params (Linear(item_fea_dim -> emb_size)).
    W = jax.random.normal(k3, (item_fea_dim, emb_size), jnp.float32) * 0.1
    b = jnp.zeros((emb_size,), jnp.float32)
    # Dense stand-in for the sparse normalized adjacency.
    adj_raw = jax.random.uniform(k4, (N, N), jnp.float32)
    adj = jnp.where(adj_raw > 0.7, adj_raw, 0.0) / 4.0

    fwd = jax.jit(
        layergcn_forward,
        static_argnames=("num_user", "num_item", "mlp_tm", "prop_tm",
                         "prop_tk"))
    u_embd, i_embd = fwd(adj, user_fea, item_fea, prompt_embedding, W, b,
                         num_user=num_user, num_item=num_item,
                         mlp_tm=64, prop_tm=128, prop_tk=128)
    jax.block_until_ready((u_embd, i_embd))

    assert u_embd.shape == (num_user, emb_size)
    assert i_embd.shape == (num_item, emb_size)

    # Tight check against a reference that mimics the kernel's bf16 MXU inputs.
    u_m, i_m = _reference_kernel_precision(
        adj, user_fea, item_fea, prompt_embedding, W, b, num_user)
    assert jnp.allclose(u_embd, u_m, atol=2e-2, rtol=2e-2)
    assert jnp.allclose(i_embd, i_m, atol=2e-2, rtol=2e-2)

    # Loose check against the pure-f32 PyTorch-semantics reference
    # (budget for the deliberate bf16-adj quantization).
    u_f, i_f = _reference_f32(
        adj, user_fea, item_fea, prompt_embedding, W, b, num_user)
    assert jnp.allclose(u_embd, u_f, atol=1e-1, rtol=5e-2)
    assert jnp.allclose(i_embd, i_f, atol=1e-1, rtol=5e-2)

    print("KERNEL_OK")
</pallas_src>

<mosaic_0001>
module attributes {stable_mosaic.version = 11 : i64} {
  func.func @mlp_kernel(%arg0: i32, %arg1: memref<64x16xf32, #tpu.memory_space<vmem>>, %arg2: memref<16x32xf32, #tpu.memory_space<vmem>>, %arg3: memref<1x32xf32, #tpu.memory_space<vmem>>, %arg4: memref<64x32xf32, #tpu.memory_space<vmem>>) attributes {dimension_semantics = [#tpu.dimension_semantics<parallel>], iteration_bounds = array<i64: 3>, scalar_prefetch = 0 : i64, scratch_operands = 0 : i64, tpu.core_type = #tpu.core_type<tc>, window_params = [{transform_indices = @transform_0, window_bounds = array<i64: 64, 16>}, {pipeline_mode = #tpu.pipeline_mode<synchronous>, transform_indices = @transform_1, window_bounds = array<i64: 16, 32>}, {pipeline_mode = #tpu.pipeline_mode<synchronous>, transform_indices = @transform_2, window_bounds = array<i64: 1, 32>}, {transform_indices = @transform_3, window_bounds = array<i64: 64, 32>}]} {
    %c0 = arith.constant 0 : index
    %c0_0 = arith.constant 0 : index
    %0 = vector.load %arg1[%c0, %c0_0] : memref<64x16xf32, #tpu.memory_space<vmem>>, vector<64x16xf32>
    %c0_1 = arith.constant 0 : index
    %c0_2 = arith.constant 0 : index
    %1 = vector.load %arg2[%c0_1, %c0_2] : memref<16x32xf32, #tpu.memory_space<vmem>>, vector<16x32xf32>
    %cst = arith.constant dense<0.000000e+00> : vector<64x32xf32>
    %2 = tpu.matmul %0, %1, %cst {dimension_numbers = #tpu.dot_dimension_numbers<[1], [0], [0], [1], [0, 0, 1, 1], [], []>} : vector<64x16xf32>, vector<16x32xf32>, vector<64x32xf32> -> vector<64x32xf32>
    %c0_3 = arith.constant 0 : index
    %c0_4 = arith.constant 0 : index
    %3 = vector.load %arg3[%c0_3, %c0_4] : memref<1x32xf32, #tpu.memory_space<vmem>>, vector<1x32xf32>
    %4 = vector.broadcast %3 : vector<1x32xf32> to vector<64x32xf32>
    %5 = arith.addf %2, %4 : vector<64x32xf32>
    %6 = math.tanh %5 : vector<64x32xf32>
    %c0_5 = arith.constant 0 : index
    %c0_6 = arith.constant 0 : index
    %7 = vector.load %arg4[%c0_5, %c0_6] : memref<64x32xf32, #tpu.memory_space<vmem>>, vector<64x32xf32>
    tpu.vector_store %arg4[%c0_5, %c0_6], %6 {strides = array<i32>} : memref<64x32xf32, #tpu.memory_space<vmem>>, vector<64x32xf32>,
    return
  }
  func.func @transform_0(%arg0: i32) -> (i32, i32) {
    %c0_i32 = arith.constant 0 : i32
    %c0_i32_0 = arith.constant 0 : i32
    return %arg0, %c0_i32 : i32, i32
  }
  func.func @transform_1(%arg0: i32) -> (i32, i32) {
    %c0_i32 = arith.constant 0 : i32
    %c0_i32_0 = arith.constant 0 : i32
    %c0_i32_1 = arith.constant 0 : i32
    return %c0_i32, %c0_i32_0 : i32, i32
  }
  func.func @transform_2(%arg0: i32) -> (i32, i32) {
    %c0_i32 = arith.constant 0 : i32
    %c0_i32_0 = arith.constant 0 : i32
    %c0_i32_1 = arith.constant 0 : i32
    return %c0_i32, %c0_i32_0 : i32, i32
  }
  func.func @transform_3(%arg0: i32) -> (i32, i32) {
    %c0_i32 = arith.constant 0 : i32
    %c0_i32_0 = arith.constant 0 : i32
    return %arg0, %c0_i32 : i32, i32
  }
}

module attributes {stable_mosaic.version = 11 : i64} {
  func.func @gcn_layer_kernel(%arg0: i32, %arg1: i32, %arg2: memref<128x128xbf16, #tpu.memory_space<vmem>>, %arg3: memref<128x32xf32, #tpu.memory_space<vmem>>, %arg4: memref<128x32xf32, #tpu.memory_space<vmem>>, %arg5: memref<128x1xf32, #tpu.memory_space<vmem>>, %arg6: memref<128x32xf32, #tpu.memory_space<vmem>>, %arg7: memref<128x32xf32, #tpu.memory_space<vmem>>, %arg8: memref<128x32xf32, #tpu.memory_space<vmem>>, %arg9: memref<128x32xf32, #tpu.memory_space<vmem>>) attributes {dimension_semantics = [#tpu.dimension_semantics<parallel>, #tpu.dimension_semantics<arbitrary>], iteration_bounds = array<i64: 2, 2>, scalar_prefetch = 0 : i64, scratch_operands = 1 : i64, tpu.core_type = #tpu.core_type<tc>, window_params = [{transform_indices = @transform_0, window_bounds = array<i64: 128, 128>}, {transform_indices = @transform_1, window_bounds = array<i64: 128, 32>}, {transform_indices = @transform_2, window_bounds = array<i64: 128, 32>}, {transform_indices = @transform_3, window_bounds = array<i64: 128, 1>}, {transform_indices = @transform_4, window_bounds = array<i64: 128, 32>}, {transform_indices = @transform_5, window_bounds = array<i64: 128, 32>}, {transform_indices = @transform_6, window_bounds = array<i64: 128, 32>}]} {
    %c0_i32 = arith.constant 0 : i32
    %0 = arith.cmpi eq, %arg1, %c0_i32 : i32
    %1 = arith.extui %0 : i1 to i32
    %c0_i32_0 = arith.constant 0 : i32
    %2 = arith.cmpi ne, %1, %c0_i32_0 : i32
    scf.if %2 {
      %cst_9 = arith.constant 0.000000e+00 : f32
      %13 = vector.broadcast %cst_9 : f32 to vector<128x32xf32>
      %c0_10 = arith.constant 0 : index
      %c0_11 = arith.constant 0 : index
      %14 = vector.load %arg9[%c0_10, %c0_11] : memref<128x32xf32, #tpu.memory_space<vmem>>, vector<128x32xf32>
      tpu.vector_store %arg9[%c0_10, %c0_11], %13 {strides = array<i32>} : memref<128x32xf32, #tpu.memory_space<vmem>>, vector<128x32xf32>,
    } else {
    }
    %c0 = arith.constant 0 : index
    %c0_1 = arith.constant 0 : index
    %3 = vector.load %arg9[%c0, %c0_1] : memref<128x32xf32, #tpu.memory_space<vmem>>, vector<128x32xf32>
    %c0_2 = arith.constant 0 : index
    %c0_3 = arith.constant 0 : index
    %4 = vector.load %arg2[%c0_2, %c0_3] : memref<128x128xbf16, #tpu.memory_space<vmem>>, vector<128x128xbf16>
    %c0_4 = arith.constant 0 : index
    %c0_5 = arith.constant 0 : index
    %5 = vector.load %arg3[%c0_4, %c0_5] : memref<128x32xf32, #tpu.memory_space<vmem>>, vector<128x32xf32>
    %6 = arith.truncf %5 : vector<128x32xf32> to vector<128x32xbf16>
    %cst = arith.constant dense<0.000000e+00> : vector<128x32xf32>
    %7 = tpu.matmul %4, %6, %cst {dimension_numbers = #tpu.dot_dimension_numbers<[1], [0], [0], [1], [0, 0, 1, 1], [], []>} : vector<128x128xbf16>, vector<128x32xbf16>, vector<128x32xf32> -> vector<128x32xf32>
    %8 = arith.addf %3, %7 : vector<128x32xf32>
    %c0_6 = arith.constant 0 : index
    %c0_7 = arith.constant 0 : index
    %9 = vector.load %arg9[%c0_6, %c0_7] : memref<128x32xf32, #tpu.memory_space<vmem>>, vector<128x32xf32>
    tpu.vector_store %arg9[%c0_6, %c0_7], %8 {strides = array<i32>} : memref<128x32xf32, #tpu.memory_space<vmem>>, vector<128x32xf32>,
    %c1_i32 = arith.constant 1 : i32
    %10 = arith.cmpi eq, %arg1, %c1_i32 : i32
    %11 = arith.extui %10 : i1 to i32
    %c0_i32_8 = arith.constant 0 : i32
    %12 = arith.cmpi ne, %11, %c0_i32_8 : i32
    scf.if %12 {
      %c0_9 = arith.constant 0 : index
      %c0_10 = arith.constant 0 : index
      %13 = vector.load %arg9[%c0_9, %c0_10] : memref<128x32xf32, #tpu.memory_space<vmem>>, vector<128x32xf32>
      %c0_11 = arith.constant 0 : index
      %c0_12 = arith.constant 0 : index
      %14 = vector.load %arg4[%c0_11, %c0_12] : memref<128x32xf32, #tpu.memory_space<vmem>>, vector<128x32xf32>
      %15 = arith.mulf %13, %14 : vector<128x32xf32>
      %cst_13 = arith.constant dense<0.000000e+00> : vector<128xf32>
      %16 = vector.multi_reduction <add>, %15, %cst_13 [1] : vector<128x32xf32> to vector<128xf32>
      %17 = vector.shape_cast %16 : vector<128xf32> to vector<128x1xf32>
      %18 = arith.mulf %13, %13 : vector<128x32xf32>
      %cst_14 = arith.constant dense<0.000000e+00> : vector<128xf32>
      %19 = vector.multi_reduction <add>, %18, %cst_14 [1] : vector<128x32xf32> to vector<128xf32>
      %20 = vector.shape_cast %19 : vector<128xf32> to vector<128x1xf32>
      %21 = math.rsqrt %20 : vector<128x1xf32>
      %cst_15 = arith.constant 1.000000e+08 : f32
      %22 = vector.broadcast %cst_15 : f32 to vector<128x1xf32>
      %23 = arith.minimumf %21, %22 : vector<128x1xf32>
      %24 = arith.mulf %17, %23 : vector<128x1xf32>
      %c0_16 = arith.constant 0 : index
      %c0_17 = arith.constant 0 : index
      %25 = vector.load %arg5[%c0_16, %c0_17] : memref<128x1xf32, #tpu.memory_space<vmem>>, vector<128x1xf32>
      %26 = arith.mulf %24, %25 : vector<128x1xf32>
      %27 = vector.broadcast %26 : vector<128x1xf32> to vector<128x32xf32>
      %28 = arith.mulf %27, %13 : vector<128x32xf32>
      %c0_18 = arith.constant 0 : index
      %c0_19 = arith.constant 0 : index
      %29 = vector.load %arg7[%c0_18, %c0_19] : memref<128x32xf32, #tpu.memory_space<vmem>>, vector<128x32xf32>
      tpu.vector_store %arg7[%c0_18, %c0_19], %28 {strides = array<i32>} : memref<128x32xf32, #tpu.memory_space<vmem>>, vector<128x32xf32>,
      %c0_20 = arith.constant 0 : index
      %c0_21 = arith.constant 0 : index
      %30 = vector.load %arg6[%c0_20, %c0_21] : memref<128x32xf32, #tpu.memory_space<vmem>>, vector<128x32xf32>
      %31 = arith.addf %30, %28 : vector<128x32xf32>
      %c0_22 = arith.constant 0 : index
      %c0_23 = arith.constant 0 : index
      %32 = vector.load %arg8[%c0_22, %c0_23] : memref<128x32xf32, #tpu.memory_space<vmem>>, vector<128x32xf32>
      tpu.vector_store %arg8[%c0_22, %c0_23], %31 {strides = array<i32>} : memref<128x32xf32, #tpu.memory_space<vmem>>, vector<128x32xf32>,
    } else {
    }
    return
  }
  func.func @transform_0(%arg0: i32, %arg1: i32) -> (i32, i32) {
    %c0_i32 = arith.constant 0 : i32
    return %arg0, %arg1 : i32, i32
  }
  func.func @transform_1(%arg0: i32, %arg1: i32) -> (i32, i32) {
    %c0_i32 = arith.constant 0 : i32
    %c0_i32_0 = arith.constant 0 : i32
    return %arg1, %c0_i32 : i32, i32
  }
  func.func @transform_2(%arg0: i32, %arg1: i32) -> (i32, i32) {
    %c0_i32 = arith.constant 0 : i32
    %c0_i32_0 = arith.constant 0 : i32
    return %arg0, %c0_i32 : i32, i32
  }
  func.func @transform_3(%arg0: i32, %arg1: i32) -> (i32, i32) {
    %c0_i32 = arith.constant 0 : i32
    %c0_i32_0 = arith.constant 0 : i32
    return %arg0, %c0_i32 : i32, i32
  }
  func.func @transform_4(%arg0: i32, %arg1: i32) -> (i32, i32) {
    %c0_i32 = arith.constant 0 : i32
    %c0_i32_0 = arith.constant 0 : i32
    return %arg0, %c0_i32 : i32, i32
  }
  func.func @transform_5(%arg0: i32, %arg1: i32) -> (i32, i32) {
    %c0_i32 = arith.constant 0 : i32
    %c0_i32_0 = arith.constant 0 : i32
    return %arg0, %c0_i32 : i32, i32
  }
  func.func @transform_6(%arg0: i32, %arg1: i32) -> (i32, i32) {
    %c0_i32 = arith.constant 0 : i32
    %c0_i32_0 = arith.constant 0 : i32
    return %arg0, %c0_i32 : i32, i32
  }
}

module attributes {stable_mosaic.version = 11 : i64} {
  func.func @gcn_layer_kernel(%arg0: i32, %arg1: i32, %arg2: memref<128x128xbf16, #tpu.memory_space<vmem>>, %arg3: memref<128x32xf32, #tpu.memory_space<vmem>>, %arg4: memref<128x32xf32, #tpu.memory_space<vmem>>, %arg5: memref<128x1xf32, #tpu.memory_space<vmem>>, %arg6: memref<128x32xf32, #tpu.memory_space<vmem>>, %arg7: memref<128x32xf32, #tpu.memory_space<vmem>>, %arg8: memref<128x32xf32, #tpu.memory_space<vmem>>, %arg9: memref<128x32xf32, #tpu.memory_space<vmem>>) attributes {dimension_semantics = [#tpu.dimension_semantics<parallel>, #tpu.dimension_semantics<arbitrary>], iteration_bounds = array<i64: 2, 2>, scalar_prefetch = 0 : i64, scratch_operands = 1 : i64, tpu.core_type = #tpu.core_type<tc>, window_params = [{transform_indices = @transform_0, window_bounds = array<i64: 128, 128>}, {transform_indices = @transform_1, window_bounds = array<i64: 128, 32>}, {transform_indices = @transform_2, window_bounds = array<i64: 128, 32>}, {transform_indices = @transform_3, window_bounds = array<i64: 128, 1>}, {transform_indices = @transform_4, window_bounds = array<i64: 128, 32>}, {transform_indices = @transform_5, window_bounds = array<i64: 128, 32>}, {transform_indices = @transform_6, window_bounds = array<i64: 128, 32>}]} {
    %c0_i32 = arith.constant 0 : i32
    %0 = arith.cmpi eq, %arg1, %c0_i32 : i32
    %1 = arith.extui %0 : i1 to i32
    %c0_i32_0 = arith.constant 0 : i32
    %2 = arith.cmpi ne, %1, %c0_i32_0 : i32
    scf.if %2 {
      %cst_9 = arith.constant 0.000000e+00 : f32
      %13 = vector.broadcast %cst_9 : f32 to vector<128x32xf32>
      %c0_10 = arith.constant 0 : index
      %c0_11 = arith.constant 0 : index
      %14 = vector.load %arg9[%c0_10, %c0_11] : memref<128x32xf32, #tpu.memory_space<vmem>>, vector<128x32xf32>
      tpu.vector_store %arg9[%c0_10, %c0_11], %13 {strides = array<i32>} : memref<128x32xf32, #tpu.memory_space<vmem>>, vector<128x32xf32>,
    } else {
    }
    %c0 = arith.constant 0 : index
    %c0_1 = arith.constant 0 : index
    %3 = vector.load %arg9[%c0, %c0_1] : memref<128x32xf32, #tpu.memory_space<vmem>>, vector<128x32xf32>
    %c0_2 = arith.constant 0 : index
    %c0_3 = arith.constant 0 : index
    %4 = vector.load %arg2[%c0_2, %c0_3] : memref<128x128xbf16, #tpu.memory_space<vmem>>, vector<128x128xbf16>
    %c0_4 = arith.constant 0 : index
    %c0_5 = arith.constant 0 : index
    %5 = vector.load %arg3[%c0_4, %c0_5] : memref<128x32xf32, #tpu.memory_space<vmem>>, vector<128x32xf32>
    %6 = arith.truncf %5 : vector<128x32xf32> to vector<128x32xbf16>
    %cst = arith.constant dense<0.000000e+00> : vector<128x32xf32>
    %7 = tpu.matmul %4, %6, %cst {dimension_numbers = #tpu.dot_dimension_numbers<[1], [0], [0], [1], [0, 0, 1, 1], [], []>} : vector<128x128xbf16>, vector<128x32xbf16>, vector<128x32xf32> -> vector<128x32xf32>
    %8 = arith.addf %3, %7 : vector<128x32xf32>
    %c0_6 = arith.constant 0 : index
    %c0_7 = arith.constant 0 : index
    %9 = vector.load %arg9[%c0_6, %c0_7] : memref<128x32xf32, #tpu.memory_space<vmem>>, vector<128x32xf32>
    tpu.vector_store %arg9[%c0_6, %c0_7], %8 {strides = array<i32>} : memref<128x32xf32, #tpu.memory_space<vmem>>, vector<128x32xf32>,
    %c1_i32 = arith.constant 1 : i32
    %10 = arith.cmpi eq, %arg1, %c1_i32 : i32
    %11 = arith.extui %10 : i1 to i32
    %c0_i32_8 = arith.constant 0 : i32
    %12 = arith.cmpi ne, %11, %c0_i32_8 : i32
    scf.if %12 {
      %c0_9 = arith.constant 0 : index
      %c0_10 = arith.constant 0 : index
      %13 = vector.load %arg9[%c0_9, %c0_10] : memref<128x32xf32, #tpu.memory_space<vmem>>, vector<128x32xf32>
      %c0_11 = arith.constant 0 : index
      %c0_12 = arith.constant 0 : index
      %14 = vector.load %arg4[%c0_11, %c0_12] : memref<128x32xf32, #tpu.memory_space<vmem>>, vector<128x32xf32>
      %15 = arith.mulf %13, %14 : vector<128x32xf32>
      %cst_13 = arith.constant dense<0.000000e+00> : vector<128xf32>
      %16 = vector.multi_reduction <add>, %15, %cst_13 [1] : vector<128x32xf32> to vector<128xf32>
      %17 = vector.shape_cast %16 : vector<128xf32> to vector<128x1xf32>
      %18 = arith.mulf %13, %13 : vector<128x32xf32>
      %cst_14 = arith.constant dense<0.000000e+00> : vector<128xf32>
      %19 = vector.multi_reduction <add>, %18, %cst_14 [1] : vector<128x32xf32> to vector<128xf32>
      %20 = vector.shape_cast %19 : vector<128xf32> to vector<128x1xf32>
      %21 = math.rsqrt %20 : vector<128x1xf32>
      %cst_15 = arith.constant 1.000000e+08 : f32
      %22 = vector.broadcast %cst_15 : f32 to vector<128x1xf32>
      %23 = arith.minimumf %21, %22 : vector<128x1xf32>
      %24 = arith.mulf %17, %23 : vector<128x1xf32>
      %c0_16 = arith.constant 0 : index
      %c0_17 = arith.constant 0 : index
      %25 = vector.load %arg5[%c0_16, %c0_17] : memref<128x1xf32, #tpu.memory_space<vmem>>, vector<128x1xf32>
      %26 = arith.mulf %24, %25 : vector<128x1xf32>
      %27 = vector.broadcast %26 : vector<128x1xf32> to vector<128x32xf32>
      %28 = arith.mulf %27, %13 : vector<128x32xf32>
      %c0_18 = arith.constant 0 : index
      %c0_19 = arith.constant 0 : index
      %29 = vector.load %arg7[%c0_18, %c0_19] : memref<128x32xf32, #tpu.memory_space<vmem>>, vector<128x32xf32>
      tpu.vector_store %arg7[%c0_18, %c0_19], %28 {strides = array<i32>} : memref<128x32xf32, #tpu.memory_space<vmem>>, vector<128x32xf32>,
      %c0_20 = arith.constant 0 : index
      %c0_21 = arith.constant 0 : index
      %30 = vector.load %arg6[%c0_20, %c0_21] : memref<128x32xf32, #tpu.memory_space<vmem>>, vector<128x32xf32>
      %31 = arith.addf %30, %28 : vector<128x32xf32>
      %c0_22 = arith.constant 0 : index
      %c0_23 = arith.constant 0 : index
      %32 = vector.load %arg8[%c0_22, %c0_23] : memref<128x32xf32, #tpu.memory_space<vmem>>, vector<128x32xf32>
      tpu.vector_store %arg8[%c0_22, %c0_23], %31 {strides = array<i32>} : memref<128x32xf32, #tpu.memory_space<vmem>>, vector<128x32xf32>,
    } else {
    }
    return
  }
  func.func @transform_0(%arg0: i32, %arg1: i32) -> (i32, i32) {
    %c0_i32 = arith.constant 0 : i32
    return %arg0, %arg1 : i32, i32
  }
  func.func @transform_1(%arg0: i32, %arg1: i32) -> (i32, i32) {
    %c0_i32 = arith.constant 0 : i32
    %c0_i32_0 = arith.constant 0 : i32
    return %arg1, %c0_i32 : i32, i32
  }
  func.func @transform_2(%arg0: i32, %arg1: i32) -> (i32, i32) {
    %c0_i32 = arith.constant 0 : i32
    %c0_i32_0 = arith.constant 0 : i32
    return %arg0, %c0_i32 : i32, i32
  }
  func.func @transform_3(%arg0: i32, %arg1: i32) -> (i32, i32) {
    %c0_i32 = arith.constant 0 : i32
    %c0_i32_0 = arith.constant 0 : i32
    return %arg0, %c0_i32 : i32, i32
  }
  func.func @transform_4(%arg0: i32, %arg1: i32) -> (i32, i32) {
    %c0_i32 = arith.constant 0 : i32
    %c0_i32_0 = arith.constant 0 : i32
    return %arg0, %c0_i32 : i32, i32
  }
  func.func @transform_5(%arg0: i32, %arg1: i32) -> (i32, i32) {
    %c0_i32 = arith.constant 0 : i32
    %c0_i32_0 = arith.constant 0 : i32
    return %arg0, %c0_i32 : i32, i32
  }
  func.func @transform_6(%arg0: i32, %arg1: i32) -> (i32, i32) {
    %c0_i32 = arith.constant 0 : i32
    %c0_i32_0 = arith.constant 0 : i32
    return %arg0, %c0_i32 : i32, i32
  }
}

</mosaic_0001>

<bundles_post_ra>
// kernel: layergcn_forward.5
= control target key start
LH: loop header
LB: loop body
LE: loop exit
PB: predicated region body
PF: predicated region fallthrough
CT: control target
= control target key end

     0   :  { %s405_s12 = smov 0   ;;  %s464_s0 = inlined_call_operand.vmem [shape: f32[192,16], index: 0, kind: input, shape index: {}]   ;;  %s465_s1 = inlined_call_operand.vmem [shape: f32[16,32], index: 1, kind: input, shape index: {}]   ;;  %s466_s2 = inlined_call_operand.vmem [shape: f32[1,32], index: 2, kind: input, shape index: {}]   ;;  %s467_s3 = inlined_call_operand.vmem [shape: f32[192,32], index: 3, kind: output, shape index: {}]  }
   0x1 LB: > { %s327_s13 = sadd.s32 4294967295, %s383_s12   ;;  %p331_p0 = scmp.ge.s32.totalorder %s383_s12, 1  ;;  %s383_s12 = sphi %s405_s12, %s13_s12  }
   0x2   : > { %p138_p1 = scmp.lt.s32.totalorder %s383_s12, 4 }
   0x4   : > { %p139_p2 = pnand %p331_p0, %p138_p1 }
   0x5   : > { %s332_s18 = sshll.u32 (!%p139_p2), %s327_s13, 3 }
   0x6   : > { %142 = sbr.rel (%p139_p2) target bundleno = 167 (0xa7), region = 32  ;;  %p163_p3 = scmp.lt.s32.totalorder (!%p139_p2), %s332_s18, 23 }
   0xb   : > { %v183_v0 = vld [vmem:[%s465_s1 + $0x8] sm:$0xff]  ;;  %v182_v1 = vld [vmem:[%s465_s1] sm:$0xff]  ;;  %s469_s18 = smov (!%p163_p3, %s332_s18), 23  ;;  %vm188_vm0 = vcmask 130048   ;;  %vm262_vm1 = vcmask 261120  }
   0xc   : > { %347 = vmatpush.msra.mxu2 %v183_v0  ;;  %348 = vmatpush.msra.mxu3 %v183_v0  ;;  %s333_s19 = sshll.u32 %s469_s18, 3  ;;  %v360_v10 = vld [vmem:[%s466_s2] ss:$0 sm:$0xff] }
   0xd   : > { %227 = vmatpush.msra.mxu0 %v183_v0  ;;  %346 = vmatpush.msra.mxu1 %v183_v0  ;;  %s166_s22 = scalar_lea.vmem %s464_s0, %s333_s19  ;;  %s443_s27 = scalar_lea.vmem %s467_s3, %s333_s19 }
   0xe   : > { %350 = vmatpush.msra.mxu2 %v182_v1  ;;  %351 = vmatpush.msra.mxu3 %v182_v1  ;;  %v178_v2 = vld [vmem:[%s166_s22 + $0x20] sm:$0xff]  ;;  %v180_v3 = vld [vmem:[%s166_s22 + $0x30] sm:$0xff]  ;;  %v179_v6 = vld [vmem:[%s166_s22 + $0x28] sm:$0xff] }
   0xf   : > { %228 = vmatpush.msra.mxu0 %v182_v1  ;;  %349 = vmatpush.msra.mxu1 %v182_v1  ;;  %v174_v4 = vld [vmem:[%s166_s22] sm:$0xff]  ;;  %v176_v5 = vld [vmem:[%s166_s22 + $0x10] sm:$0xff]  ;;  %v181_v7 = vld [vmem:[%s166_s22 + $0x38] sm:$0xff] }
  0x10   : > { %340 = vmatmul.msk.f32.vlgmr.msra.gmra.mxu2 %vm188_vm0, %v178_v2  ;;  %342 = vmatmul.msk.f32.vlgmr.msra.gmra.mxu3 %vm188_vm0, %v180_v3  ;;  %v175_v8 = vld [vmem:[%s166_s22 + $0x8] sm:$0xff]  ;;  %v177_v9 = vld [vmem:[%s166_s22 + $0x18] sm:$0xff] }
  0x11   : > { %336 = vmatmul.msk.f32.vlgmr.msra.gmra.mxu0 %vm188_vm0, %v174_v4  ;;  %338 = vmatmul.msk.f32.vlgmr.msra.gmra.mxu1 %vm188_vm0, %v176_v5 }
  0x18   : > { %341 = vmatmul.msk.f32.gmra.mxu2 %vm188_vm0, %v179_v6  ;;  %343 = vmatmul.msk.f32.gmra.mxu3 %vm188_vm0, %v181_v7 }
  0x19   : > { %337 = vmatmul.msk.f32.gmra.mxu0 %vm188_vm0, %v175_v8  ;;  %339 = vmatmul.msk.f32.gmra.mxu1 %vm188_vm0, %v177_v9 }
  0x8e   : > { %v230_v11 = vpop.f32.mrf.mxu0  ;;  %v236_v12 = vpop.f32.mrf.mxu1 }
  0x8f   : > { %v231_v13 = vadd.f32 %v360_v10, %v230_v11  ;;  %v237_v14 = vadd.f32 %v360_v10, %v236_v12 }
  0x91   : > { %361 = vtanh.f32 %v231_v13 }
  0x92   : > { %363 = vtanh.f32 %v237_v14 }
  0x93   : > { %v242_v15 = vpop.f32.mrf.mxu2  ;;  %v248_v16 = vpop.f32.mrf.mxu3 }
  0x94   : > { %v243_v17 = vadd.f32 %v360_v10, %v242_v15  ;;  %v249_v18 = vadd.f32 %v360_v10, %v248_v16 }
  0x96   : > { %365 = vtanh.f32 %v243_v17  ;;  %v233_v19 = vpop.f32.mrf.mxu0  ;;  %v239_v20 = vpop.f32.mrf.mxu1 }
  0x97   : > { %v362_v21 = vpop.eup %361  ;;  %367 = vtanh.f32 %v249_v18  ;;  %v234_v22 = vadd.f32 %v360_v10, %v233_v19  ;;  %v240_v23 = vadd.f32 %v360_v10, %v239_v20 }
  0x98   : > { %v364_v24 = vpop.eup %363  ;;  %263 = vst.msk [vmem:[%s443_s27] sm:$0xff] %vm262_vm1, %v362_v21 }
  0x99   : > { %265 = vst.msk [vmem:[%s443_s27 + $0x10] sm:$0xff] %vm262_vm1, %v364_v24  ;;  %369 = vtanh.f32 %v234_v22 }
  0x9a   : > { %371 = vtanh.f32 %v240_v23 }
  0x9b   : > { %v245_v25 = vpop.f32.mrf.mxu2  ;;  %v251_v26 = vpop.f32.mrf.mxu3 }
  0x9c   : > { %v366_v27 = vpop.eup %365  ;;  %v246_v28 = vadd.f32 %v360_v10, %v245_v25  ;;  %v252_v29 = vadd.f32 %v360_v10, %v251_v26 }
  0x9d   : > { %v368_v30 = vpop.eup %367  ;;  %267 = vst.msk [vmem:[%s443_s27 + $0x20] sm:$0xff] %vm262_vm1, %v366_v27 }
  0x9e   : > { %269 = vst.msk [vmem:[%s443_s27 + $0x30] sm:$0xff] %vm262_vm1, %v368_v30  ;;  %373 = vtanh.f32 %v246_v28 }
  0x9f   : > { %v370_v31 = vpop.eup %369  ;;  %375 = vtanh.f32 %v252_v29 }
  0xa0   : > { %v372_v32 = vpop.eup %371  ;;  %264 = vst.msk [vmem:[%s443_s27 + $0x8] sm:$0xff] %vm262_vm1, %v370_v31 }
  0xa1   : > { %266 = vst.msk [vmem:[%s443_s27 + $0x18] sm:$0xff] %vm262_vm1, %v372_v32 }
  0xa4   : > { %v374_v33 = vpop.eup %373 }
  0xa5   : > { %v376_v34 = vpop.eup %375  ;;  %268 = vst.msk [vmem:[%s443_s27 + $0x28] sm:$0xff] %vm262_vm1, %v374_v33 }
  0xa6   : > { %270 = vst.msk [vmem:[%s443_s27 + $0x38] sm:$0xff] %vm262_vm1, %v376_v34 }
  0xa7 PF: > { %s13_s12 = sadd.s32 1, %s383_s12  }
  0xa8   : > { %p10_p4 = scmp.ge.s32.totalorder %s13_s12, 5  }
  0xaa   :  { %12 = sbr.rel (!%p10_p4) target bundleno = 1 (0x1), region = 62 }

// kernel: layergcn_forward.9
= control target key start
LH: loop header
LB: loop body
LE: loop exit
PB: predicated region body
PF: predicated region fallthrough
CT: control target
= control target key end

     0   :  { %s2581_s0 = inlined_call_operand.vmem [shape: bf16[256,256], index: 0, kind: input, shape index: {}]   ;;  %s2582_s1 = inlined_call_operand.vmem [shape: f32[256,32], index: 1, kind: input, shape index: {}]   ;;  %s2583_s2 = inlined_call_operand.vmem [shape: f32[256,32], index: 2, kind: input, shape index: {}]   ;;  %s2584_s3 = inlined_call_operand.vmem [shape: f32[256,1], index: 3, kind: input, shape index: {}]   ;;  %s2585_s4 = inlined_call_operand.vmem [shape: f32[256,32], index: 4, kind: input, shape index: {}, may-alias: {4,6}]   ;;  %s2586_s5 = inlined_call_operand.hbm [shape: f32[256,32], index: 5, kind: output, shape index: {0}]   ;;  %s2587_s6 = inlined_call_operand.vmem [shape: f32[256,32], index: 6, kind: output, shape index: {1}, may-alias: {4,6}]  }
   0x1   :  { %2595 = sst [smem:[#allocation15_spill]] %s2581_s0 }
   0x2   :  { %12 = vsyncpa [#allocation5], 0 }
   0x3   :  { %14 = vsyncpa [#allocation5 + $0x1], 0  ;;  %s1779_s21 = smov 0   ;;  %s1781_s22 = smov 0  }
   0x4   :  { %s1783_s23 = smov 0   ;;  %s1785_s24 = smov 0  }
   0x5   :  { %s1787_s25 = smov 0   ;;  %s1789_s26 = smov 0  }
   0x6   :  { %s1791_s27 = smov 0   ;;  %s1793_s28 = smov 0  }
   0x7   :  { %s1795_s29 = smov 0   ;;  %s1797_s30 = smov 0  }
   0x8 LB: > { %2596 = sst [smem:[#allocation7_spill]] %s1710_s23  ;;  %s1408_s7 = sadd.s32 4294967295, %s1738_s30   ;;  %s1738_s30 = sphi %s1797_s30, %s20_s30   ;;  %s1734_s29 = sphi %s1795_s29, %s2636_s29   ;;  %s1730_s28 = sphi %s1793_s28, %s2639_s28   ;;  %s1726_s27 = sphi %s1791_s27, %s2634_s27   ;;  %s1722_s26 = sphi %s1789_s26, %s2633_s26   ;;  %s1718_s25 = sphi %s1787_s25, %s2632_s25   ;;  %s1714_s24 = sphi %s1785_s24, %s2631_s24   ;;  %s1710_s23 = sphi %s1783_s23, %s2630_s23   ;;  %s1706_s22 = sphi %s1781_s22, %s2638_s22   ;;  %s1702_s21 = sphi %s1779_s21, %s2637_s21  }
   0x9   : > { %2597 = sst [smem:[#allocation8_spill]] %s1718_s25  ;;  %s1409_s8 = sadd.s32 4294967294, %s1738_s30  }
   0xa   : > { %2598 = sst [smem:[#allocation9_spill]] %s1730_s28  ;;  %s29_s9 = sadd.s32 1, %s1730_s28 }
   0xb   : > { %2599 = sst [smem:[#allocation10_spill]] %s1734_s29  ;;  %s32_s10 = sadd.s32 1, %s1734_s29 }
   0xc   : > { %p30_p0 = scmp.ge.s32.totalorder %s29_s9, 2  ;;  %s41_s11 = sadd.s32 1, %s1718_s25 }
   0xd   : > { %p48_p1 = scmp.ne.s32.totalorder %s1718_s25, %s1714_s24  ;;  %p49_p2 = scmp.eq.s32.totalorder %s1738_s30, 0 }
   0xe   : > { %s2641_s9 = smov (%p30_p0, %s29_s9), 0  ;;  %s2643_s10 = smov (!%p30_p0, %s32_s10), %s1734_s29 }
   0xf   : > { %2600 = sst [smem:[#allocation11_spill]] %s2641_s9  ;;  %s37_s12 = ssub.s32 %s1730_s28, %s2641_s9 }
  0x10   : > { %p1842_p3 = por %p49_p2, %p48_p1  ;;  %p34_p4 = scmp.ge.s32.totalorder %s2643_s10, 2 }
  0x11   : > { %s171_s14 = sadd.s32 1, %s1710_s23  ;;  %p181_p5 = scmp.ne.s32.totalorder %s1710_s23, %s1706_s22 }
  0x12   : > { %p182_p6 = scmp.eq.s32.totalorder %s1408_s7, 3  ;;  %s2645_s10 = smov (%p34_p4, %s2643_s10), 0 }
  0x13   : > { %2602 = sst [smem:[#allocation12_spill]] %s2645_s10  ;;  %p187_p8 = scmp.ne.s32.totalorder %s1706_s22, %s1702_s21 }
  0x14   : > { %p1851_p7 = por %p182_p6, %p181_p5  ;;  %s36_s16 = ssub.s32 %s1734_s29, %s2645_s10 }
  0x15   : > { %p188_p9 = scmp.eq.s32.totalorder %s1409_s8, 3  ;;  %s38_s17 = sor.u32 %s37_s12, %s36_s16 }
  0x16   : > { %p169_p10 = scmp.eq.s32.totalorder %s36_s16, 0  ;;  %p39_p11 = scmp.eq.s32.totalorder %s38_s17, 0 }
  0x17   : > { %p1859_p12 = por %p188_p9, %p187_p8  ;;  %p1411_p13 = scmp.ge.s32.totalorder %s1738_s30, 4 }
  0x18   : > { %s1864_s19 = scalar_select %p169_p10, %s1710_s23, %s171_s14  }
  0x19   : > { %s1867_s20 = scalar_select %p39_p11, %s1718_s25, %s41_s11  }
  0x1a   : > { %2605 = sst [smem:[#allocation13_spill]] %s1864_s19  ;;  %230 = sbr.rel (%p1411_p13) target bundleno = 57 (0x39), region = 16 }
  0x1b   : > { %2606 = sst [smem:[#allocation14_spill]] %s1867_s20 }
  0x1f   : > { %233 = sbr.rel (!%p1842_p3) target bundleno = 57 (0x39), region = 20  ;;  %s235_s7 = sand.u32 (%p1842_p3), 1, %s1718_s25  }
  0x20   : > { %s1468_s8 = sshll.u32 (%p1842_p3), %s1734_s29, 5  ;;  %s1412_s12 = sshll.u32 (%p1842_p3), %s235_s7, 6 }
  0x21   : > { %s240_s16 = sadd.s32 (%p1842_p3), %s1730_s28, %s1468_s8  ;;  %s2607_s0 = sld [smem:[#allocation15_spill]] (%p1842_p3) }
  0x22   : > { %s1415_s17 = sshll.u32 (%p1842_p3), %s240_s16, 2  ;;  %s237_s11 = scalar_lea.vmem (%p1842_p3), [#allocation3], %s1412_s12 }
  0x27   : > { %s1878_s14 = scalar_lea.vmem %s2607_s0, %s1415_s17 }
  0x28   : > { %v259_v0 = vld [vmem:[%s1878_s14] sm:$0xf]  ;;  %v261_v1 = vld [vmem:[%s1878_s14 + $0x8] sm:$0xf]  ;;  %v263_v2 = vld [vmem:[%s1878_s14 + $0x10] sm:$0xf] }
  0x29   : > { %260 = vst [vmem:[%s237_s11] sm:$0xf] %v259_v0  ;;  %v265_v3 = vld [vmem:[%s1878_s14 + $0x18] sm:$0xf]  ;;  %v267_v4 = vld [vmem:[%s1878_s14 + $0x20] sm:$0xf] }
  0x2a   : > { %262 = vst [vmem:[%s237_s11 + $0x4] sm:$0xf] %v261_v1  ;;  %v269_v5 = vld [vmem:[%s1878_s14 + $0x28] sm:$0xf]  ;;  %v271_v6 = vld [vmem:[%s1878_s14 + $0x30] sm:$0xf] }
  0x2b   : > { %264 = vst [vmem:[%s237_s11 + $0x8] sm:$0xf] %v263_v2  ;;  %v273_v7 = vld [vmem:[%s1878_s14 + $0x38] sm:$0xf]  ;;  %v275_v8 = vld [vmem:[%s1878_s14 + $0x40] sm:$0xf] }
  0x2c   : > { %266 = vst [vmem:[%s237_s11 + $0xc] sm:$0xf] %v265_v3  ;;  %v277_v9 = vld [vmem:[%s1878_s14 + $0x48] sm:$0xf]  ;;  %v279_v10 = vld [vmem:[%s1878_s14 + $0x50] sm:$0xf] }
  0x2d   : > { %268 = vst [vmem:[%s237_s11 + $0x10] sm:$0xf] %v267_v4  ;;  %v281_v11 = vld [vmem:[%s1878_s14 + $0x58] sm:$0xf]  ;;  %v283_v12 = vld [vmem:[%s1878_s14 + $0x60] sm:$0xf] }
  0x2e   : > { %270 = vst [vmem:[%s237_s11 + $0x14] sm:$0xf] %v269_v5  ;;  %v285_v13 = vld [vmem:[%s1878_s14 + $0x68] sm:$0xf]  ;;  %v287_v14 = vld [vmem:[%s1878_s14 + $0x70] sm:$0xf] }
  0x2f   : > { %272 = vst [vmem:[%s237_s11 + $0x18] sm:$0xf] %v271_v6  ;;  %v289_v15 = vld [vmem:[%s1878_s14 + $0x78] sm:$0xf] }
  0x30   : > { %274 = vst [vmem:[%s237_s11 + $0x1c] sm:$0xf] %v273_v7 }
  0x31   : > { %276 = vst [vmem:[%s237_s11 + $0x20] sm:$0xf] %v275_v8 }
  0x32   : > { %278 = vst [vmem:[%s237_s11 + $0x24] sm:$0xf] %v277_v9 }
  0x33   : > { %280 = vst [vmem:[%s237_s11 + $0x28] sm:$0xf] %v279_v10 }
  0x34   : > { %282 = vst [vmem:[%s237_s11 + $0x2c] sm:$0xf] %v281_v11 }
  0x35   : > { %284 = vst [vmem:[%s237_s11 + $0x30] sm:$0xf] %v283_v12 }
  0x36   : > { %286 = vst [vmem:[%s237_s11 + $0x34] sm:$0xf] %v285_v13 }
  0x37   : > { %288 = vst [vmem:[%s237_s11 + $0x38] sm:$0xf] %v287_v14 }
  0x38   : > { %290 = vst [vmem:[%s237_s11 + $0x3c] sm:$0xf] %v289_v15 }
  0x39 PF: > { %p1416_p0 = scmp.ge.s32.totalorder %s1738_s30, 1  ;;  %p381_p1 = scmp.lt.s32.totalorder %s1738_s30, 5 }
  0x3b   : > { %p382_p2 = pnand %p1416_p0, %p381_p1 }
  0x3c   : > { %s388_s9 = sand.u32 (!%p382_p2), 1, %s1714_s24   ;;  %s2592_s10 = sand.u32 (!%p382_p2), 1, %s1706_s22  }
  0x3d   : > { %385 = sbr.rel (%p382_p2) target bundleno = 654 (0x28e), region = 77  ;;  %s1417_s13 = sshll.u32 (!%p382_p2), %s388_s9, 6 }
  0x3e   : > { %s1418_s7 = sshll.u32 (!%p382_p2), %s2592_s10, 7  ;;  %s1419_s8 = sshll.u32 (!%p382_p2), %s1722_s26, 4 }
  0x3f   : > { %s1421_s12 = sshll.u32 (!%p382_p2), %s1726_s27, 4  ;;  %p444_p3 = scmp.lt.s32.totalorder (!%p382_p2), %s1419_s8, 31 }
  0x40   : > { %p450_p4 = scmp.lt.s32.totalorder (!%p382_p2), %s1421_s12, 31  ;;  %s1931_s28 = scalar_lea.vmem (!%p382_p2), [#allocation4], %s1418_s7 }
  0x41   : > { %p1429_p5 = scmp.ne.s32.totalorder (!%p382_p2), %s1722_s26, 0 }
  0x42   : > { %s2647_s8 = smov (!%p444_p3, %s1419_s8), 31  ;;  %s2649_s12 = smov (!%p450_p4, %s1421_s12), 31 }
  0x43   : > { %s1420_s16 = sshll.u32 %s2647_s8, 3  ;;  %s1422_s0 = sshll.u32 %s2649_s12, 3 }
  0x44   : > { %s1907_s11 = scalar_lea.vmem %s2582_s1, %s1420_s16  ;;  %s1912_s24 = scalar_lea.vmem %s2583_s2, %s1422_s0 }
  0x45   : > { %s1917_s20 = scalar_lea.vmem %s2584_s3, %s1422_s0  ;;  %s1922_s8 = scalar_lea.vmem %s2585_s4, %s1422_s0 }
  0x46   : > { %s1927_s16 = scalar_lea.vmem %s2587_s6, %s1422_s0  ;;  %s1929_s12 = scalar_lea.vmem [#allocation3], %s1417_s13 }
  0x47   : > { %477 = sbr.rel (%p1429_p5) target bundleno = 93 (0x5d), region = 85 }
  0x4c   : > { %vm478_vm0 = vcmask 261120   ;;  %v1740_v16 = vmov 0.0  }
  0x4d   : > { %479 = vst.msk [vmem:[#allocation2] sm:$0xff] %vm478_vm0, %v1740_v16 }
  0x4e   : > { %480 = vst.msk [vmem:[#allocation2 + $0x8] sm:$0xff] %vm478_vm0, %v1740_v16 }
  0x4f   : > { %481 = vst.msk [vmem:[#allocation2 + $0x10] sm:$0xff] %vm478_vm0, %v1740_v16 }
  0x50   : > { %482 = vst.msk [vmem:[#allocation2 + $0x18] sm:$0xff] %vm478_vm0, %v1740_v16 }
  0x51   : > { %483 = vst.msk [vmem:[#allocation2 + $0x20] sm:$0xff] %vm478_vm0, %v1740_v16 }
  0x52   : > { %484 = vst.msk [vmem:[#allocation2 + $0x28] sm:$0xff] %vm478_vm0, %v1740_v16 }
  0x53   : > { %485 = vst.msk [vmem:[#allocation2 + $0x30] sm:$0xff] %vm478_vm0, %v1740_v16 }
  0x54   : > { %486 = vst.msk [vmem:[#allocation2 + $0x38] sm:$0xff] %vm478_vm0, %v1740_v16 }
  0x55   : > { %487 = vst.msk [vmem:[#allocation2 + $0x40] sm:$0xff] %vm478_vm0, %v1740_v16 }
  0x56   : > { %488 = vst.msk [vmem:[#allocation2 + $0x48] sm:$0xff] %vm478_vm0, %v1740_v16 }
  0x57   : > { %489 = vst.msk [vmem:[#allocation2 + $0x50] sm:$0xff] %vm478_vm0, %v1740_v16 }
  0x58   : > { %490 = vst.msk [vmem:[#allocation2 + $0x58] sm:$0xff] %vm478_vm0, %v1740_v16 }
  0x59   : > { %491 = vst.msk [vmem:[#allocation2 + $0x60] sm:$0xff] %vm478_vm0, %v1740_v16 }
  0x5a   : > { %492 = vst.msk [vmem:[#allocation2 + $0x68] sm:$0xff] %vm478_vm0, %v1740_v16 }
  0x5b   : > { %493 = vst.msk [vmem:[#allocation2 + $0x70] sm:$0xff] %vm478_vm0, %v1740_v16 }
  0x5c   : > { %494 = vst.msk [vmem:[#allocation2 + $0x78] sm:$0xff] %vm478_vm0, %v1740_v16 }
  0x5d PF: > { %v541_v17 = vld [vmem:[%s1907_s11 + $0x70] sm:$0xff]  ;;  %v542_v18 = vld [vmem:[%s1907_s11 + $0x78] sm:$0xff]  ;;  %v539_v19 = vld [vmem:[%s1907_s11 + $0x60] sm:$0xff]  ;;  %vm664_vm1 = vcmask 261120   ;;  %p1462_p6 = scmp.ne.s32.totalorder %s1722_s26, 1 }
  0x5e   : > { %v550_v20 = vpack.c.bf16 %v542_v18, %v541_v17  ;;  %v540_v21 = vld [vmem:[%s1907_s11 + $0x68] sm:$0xff]  ;;  %v537_v23 = vld [vmem:[%s1907_s11 + $0x50] sm:$0xff]  ;;  %v538_v24 = vld [vmem:[%s1907_s11 + $0x58] sm:$0xff] }
  0x5f   : > { %v549_v22 = vpack.c.bf16 %v540_v21, %v539_v19  ;;  %v548_v25 = vpack.c.bf16 %v538_v24, %v537_v23  ;;  %v535_v26 = vld [vmem:[%s1907_s11 + $0x40] sm:$0xff]  ;;  %v536_v27 = vld [vmem:[%s1907_s11 + $0x48] sm:$0xff]  ;;  %v533_v29 = vld [vmem:[%s1907_s11 + $0x30] sm:$0xff] }
  0x60   : > { %599 = vmatpush.bf16.msra.mxu0 %v550_v20  ;;  %1478 = vmatpush.bf16.msra.mxu1 %v550_v20  ;;  %v547_v28 = vpack.c.bf16 %v536_v27, %v535_v26  ;;  %v534_v30 = vld [vmem:[%s1907_s11 + $0x38] sm:$0xff]  ;;  %v531_v32 = vld [vmem:[%s1907_s11 + $0x20] sm:$0xff]  ;;  %v532_v33 = vld [vmem:[%s1907_s11 + $0x28] sm:$0xff] }
  0x61   : > { %1479 = vmatpush.bf16.msra.mxu2 %v550_v20  ;;  %1480 = vmatpush.bf16.msra.mxu3 %v550_v20  ;;  %v546_v31 = vpack.c.bf16 %v534_v30, %v533_v29  ;;  %v545_v34 = vpack.c.bf16 %v532_v33, %v531_v32  ;;  %v529_v35 = vld [vmem:[%s1907_s11 + $0x10] sm:$0xff]  ;;  %v530_v36 = vld [vmem:[%s1907_s11 + $0x18] sm:$0xff]  ;;  %v527_v38 = vld [vmem:[%s1907_s11] sm:$0xff] }
  0x62   : > { %v544_v37 = vpack.c.bf16 %v530_v36, %v529_v35  ;;  %v528_v39 = vld [vmem:[%s1907_s11 + $0x8] sm:$0xff]  ;;  %v1469_v41 = vld [vmem:[%s1929_s12] sm:$0xff]  ;;  %v1471_v42 = vld [vmem:[%s1929_s12 + $0x10] sm:$0xff] }
  0x63   : > { %v543_v40 = vpack.c.bf16 %v528_v39, %v527_v38  ;;  %v1473_v43 = vld [vmem:[%s1929_s12 + $0x20] sm:$0xff]  ;;  %v1475_v44 = vld [vmem:[%s1929_s12 + $0x30] sm:$0xff]  ;;  %v1470_v45 = vld [vmem:[%s1929_s12 + $0x8] sm:$0xff] }
  0x64   : > { %600 = vmatpush.bf16.msra.mxu0 %v549_v22  ;;  %1481 = vmatpush.bf16.msra.mxu1 %v549_v22  ;;  %v1472_v46 = vld [vmem:[%s1929_s12 + $0x18] sm:$0xff]  ;;  %v1474_v47 = vld [vmem:[%s1929_s12 + $0x28] sm:$0xff]  ;;  %v495_v49 = vld [vmem:[#allocation2] sm:$0xff] }
  0x65   : > { %1482 = vmatpush.bf16.msra.mxu2 %v549_v22  ;;  %1483 = vmatpush.bf16.msra.mxu3 %v549_v22  ;;  %v1476_v48 = vld [vmem:[%s1929_s12 + $0x38] sm:$0xff]  ;;  %v499_v50 = vld [vmem:[#allocation2 + $0x20] sm:$0xff]  ;;  %v496_v57 = vld [vmem:[#allocation2 + $0x8] sm:$0xff] }
  0x66   : > { %v503_v55 = vld [vmem:[#allocation2 + $0x40] sm:$0xff]  ;;  %v500_v58 = vld [vmem:[#allocation2 + $0x28] sm:$0xff]  ;;  %v497_v5 = vld [vmem:[#allocation2 + $0x10] sm:$0xff] }
  0x67   : > { %v507_v56 = vld [vmem:[#allocation2 + $0x60] sm:$0xff]  ;;  %v504_v3 = vld [vmem:[#allocation2 + $0x48] sm:$0xff]  ;;  %v501_v6 = vld [vmem:[#allocation2 + $0x30] sm:$0xff] }
  0x68   : > { %601 = vmatpush.bf16.msra.mxu0 %v548_v25  ;;  %1484 = vmatpush.bf16.msra.mxu1 %v548_v25  ;;  %v508_v4 = vld [vmem:[#allocation2 + $0x68] sm:$0xff]  ;;  %v505_v15 = vld [vmem:[#allocation2 + $0x50] sm:$0xff]  ;;  %v498_v17 = vld [vmem:[#allocation2 + $0x18] sm:$0xff] }
  0x69   : > { %1485 = vmatpush.bf16.msra.mxu2 %v548_v25  ;;  %1486 = vmatpush.bf16.msra.mxu3 %v548_v25  ;;  %v509_v16 = vld [vmem:[#allocation2 + $0x70] sm:$0xff]  ;;  %v502_v18 = vld [vmem:[#allocation2 + $0x38] sm:$0xff] }
  0x6a   : > { %v506_v27 = vld [vmem:[#allocation2 + $0x58] sm:$0xff] }
  0x6c   : > { %602 = vmatpush.bf16.msra.mxu0 %v547_v28  ;;  %1487 = vmatpush.bf16.msra.mxu1 %v547_v28 }
  0x6d   : > { %1488 = vmatpush.bf16.msra.mxu2 %v547_v28  ;;  %1489 = vmatpush.bf16.msra.mxu3 %v547_v28  ;;  %v510_v28 = vld [vmem:[#allocation2 + $0x78] sm:$0xff] }
  0x70   : > { %603 = vmatpush.bf16.msra.mxu0 %v546_v31  ;;  %1490 = vmatpush.bf16.msra.mxu1 %v546_v31 }
  0x71   : > { %1491 = vmatpush.bf16.msra.mxu2 %v546_v31  ;;  %1492 = vmatpush.bf16.msra.mxu3 %v546_v31 }
  0x74   : > { %604 = vmatpush.bf16.msra.mxu0 %v545_v34  ;;  %1493 = vmatpush.bf16.msra.mxu1 %v545_v34 }
  0x75   : > { %1494 = vmatpush.bf16.msra.mxu2 %v545_v34  ;;  %1495 = vmatpush.bf16.msra.mxu3 %v545_v34 }
  0x78   : > { %605 = vmatpush.bf16.msra.mxu0 %v544_v37  ;;  %1496 = vmatpush.bf16.msra.mxu1 %v544_v37 }
  0x79   : > { %1497 = vmatpush.bf16.msra.mxu2 %v544_v37  ;;  %1498 = vmatpush.bf16.msra.mxu3 %v544_v37 }
  0x7c   : > { %606 = vmatpush.bf16.msra.mxu0 %v543_v40  ;;  %1499 = vmatpush.bf16.msra.mxu1 %v543_v40 }
  0x7d   : > { %1500 = vmatpush.bf16.msra.mxu2 %v543_v40  ;;  %1501 = vmatpush.bf16.msra.mxu3 %v543_v40 }
  0x7f   : > { %607 = vmatmul.bf16.vlgmr.msra.gmra.mxu0 %v1469_v41  ;;  %617 = vmatmul.bf16.vlgmr.msra.gmra.mxu1 %v1471_v42 }
  0x80   : > { %627 = vmatmul.bf16.vlgmr.msra.gmra.mxu2 %v1473_v43  ;;  %637 = vmatmul.bf16.vlgmr.msra.gmra.mxu3 %v1475_v44 }
  0x8f   : > { %612 = vmatmul.bf16.gmra.mxu0 %v1470_v45  ;;  %622 = vmatmul.bf16.gmra.mxu1 %v1472_v46 }
  0x90   : > { %632 = vmatmul.bf16.gmra.mxu2 %v1474_v47  ;;  %642 = vmatmul.bf16.gmra.mxu3 %v1476_v48 }
  0xfc   : > { %v608_v51 = vpop.f32.mrf.mxu0  ;;  %v618_v52 = vpop.f32.mrf.mxu1 }
  0xfd   : > { %v648_v53 = vadd.f32 %v608_v51, %v495_v49  ;;  %v652_v54 = vadd.f32 %v618_v52, %v499_v50 }
  0xff   : > { %665 = vst.msk [vmem:[#allocation2] sm:$0xff] %vm664_vm1, %v648_v53 }
 0x100   : > { %669 = vst.msk [vmem:[#allocation2 + $0x20] sm:$0xff] %vm664_vm1, %v652_v54 }
 0x103   : > { %v628_v59 = vpop.f32.mrf.mxu2  ;;  %v638_v60 = vpop.f32.mrf.mxu3 }
 0x104   : > { %v656_v61 = vadd.f32 %v628_v59, %v503_v55  ;;  %v660_v62 = vadd.f32 %v638_v60, %v507_v56  ;;  %v610_v63 = vpop.f32.mrf.mxu0  ;;  %v620_v0 = vpop.f32.mrf.mxu1 }
 0x105   : > { %v649_v1 = vadd.f32 %v610_v63, %v496_v57  ;;  %v653_v2 = vadd.f32 %v620_v0, %v500_v58 }
 0x106   : > { %673 = vst.msk [vmem:[#allocation2 + $0x40] sm:$0xff] %vm664_vm1, %v656_v61 }
 0x107   : > { %677 = vst.msk [vmem:[#allocation2 + $0x60] sm:$0xff] %vm664_vm1, %v660_v62 }
 0x108   : > { %666 = vst.msk [vmem:[#allocation2 + $0x8] sm:$0xff] %vm664_vm1, %v649_v1 }
 0x109   : > { %670 = vst.msk [vmem:[#allocation2 + $0x28] sm:$0xff] %vm664_vm1, %v653_v2 }
 0x10b   : > { %v630_v7 = vpop.f32.mrf.mxu2  ;;  %v640_v8 = vpop.f32.mrf.mxu3 }
 0x10c   : > { %v657_v9 = vadd.f32 %v630_v7, %v504_v3  ;;  %v661_v10 = vadd.f32 %v640_v8, %v508_v4  ;;  %v613_v11 = vpop.f32.mrf.mxu0  ;;  %v623_v12 = vpop.f32.mrf.mxu1 }
 0x10d   : > { %v650_v13 = vadd.f32 %v613_v11, %v497_v5  ;;  %v654_v14 = vadd.f32 %v623_v12, %v501_v6 }
 0x10e   : > { %674 = vst.msk [vmem:[#allocation2 + $0x48] sm:$0xff] %vm664_vm1, %v657_v9 }
 0x10f   : > { %678 = vst.msk [vmem:[#allocation2 + $0x68] sm:$0xff] %vm664_vm1, %v661_v10 }
 0x110   : > { %667 = vst.msk [vmem:[#allocation2 + $0x10] sm:$0xff] %vm664_vm1, %v650_v13 }
 0x111   : > { %671 = vst.msk [vmem:[#allocation2 + $0x30] sm:$0xff] %vm664_vm1, %v654_v14 }
 0x113   : > { %v633_v19 = vpop.f32.mrf.mxu2  ;;  %v643_v20 = vpop.f32.mrf.mxu3 }
 0x114   : > { %v658_v21 = vadd.f32 %v633_v19, %v505_v15  ;;  %v662_v22 = vadd.f32 %v643_v20, %v509_v16  ;;  %v615_v23 = vpop.f32.mrf.mxu0  ;;  %v625_v24 = vpop.f32.mrf.mxu1 }
 0x115   : > { %v651_v25 = vadd.f32 %v615_v23, %v498_v17  ;;  %v655_v26 = vadd.f32 %v625_v24, %v502_v18 }
 0x116   : > { %675 = vst.msk [vmem:[#allocation2 + $0x50] sm:$0xff] %vm664_vm1, %v658_v21 }
 0x117   : > { %679 = vst.msk [vmem:[#allocation2 + $0x70] sm:$0xff] %vm664_vm1, %v662_v22 }
 0x118   : > { %668 = vst.msk [vmem:[#allocation2 + $0x18] sm:$0xff] %vm664_vm1, %v651_v25 }
 0x119   : > { %672 = vst.msk [vmem:[#allocation2 + $0x38] sm:$0xff] %vm664_vm1, %v655_v26 }
 0x11b   : > { %v635_v29 = vpop.f32.mrf.mxu2  ;;  %v645_v30 = vpop.f32.mrf.mxu3  ;;  %684 = sbr.rel (%p1462_p6) target bundleno = 638 (0x27e), region = 89 }
 0x11c   : > { %v659_v31 = vadd.f32 %v635_v29, %v506_v27  ;;  %v663_v32 = vadd.f32 %v645_v30, %v510_v28 }
 0x11e   : > { %676 = vst.msk [vmem:[#allocation2 + $0x58] sm:$0xff] %vm664_vm1, %v659_v31 }
 0x11f   : > { %680 = vst.msk [vmem:[#allocation2 + $0x78] sm:$0xff] %vm664_vm1, %v663_v32 }
 0x120   : > { %v1991_v33 = vld [vmem:[#allocation2 + $0x20] sm:$0xff]  ;;  %v1994_v35 = vld [vmem:[#allocation2 + $0x10] sm:$0xff]  ;;  %v2003_v42 = vld [vmem:[#allocation2 + $0x28] sm:$0xff] }
 0x121   : > { %v705_v34 = vld [vmem:[%s1912_s24 + $0x20] sm:$0xff]  ;;  %v703_v37 = vld [vmem:[%s1912_s24 + $0x10] sm:$0xff]  ;;  %v706_v43 = vld [vmem:[%s1912_s24 + $0x28] sm:$0xff] }
 0x122   : > { %v721_v36 = vmul.f32 %v705_v34, %v1991_v33  ;;  %v1998_v38 = vld [vmem:[#allocation2] sm:$0xff]  ;;  %v719_v40 = vmul.f32 %v703_v37, %v1994_v35  ;;  %v2006_v44 = vld [vmem:[#allocation2 + $0x18] sm:$0xff]  ;;  %v2010_v47 = vld [vmem:[#allocation2 + $0x8] sm:$0xff]  ;;  %v722_v51 = vmul.f32 %v706_v43, %v2003_v42  ;;  %v783_v43 = vmul.f32 %v1994_v35, %v1994_v35 }
 0x123   : > { %v701_v39 = vld [vmem:[%s1912_s24] sm:$0xff]  ;;  %v704_v46 = vld [vmem:[%s1912_s24 + $0x18] sm:$0xff]  ;;  %v702_v48 = vld [vmem:[%s1912_s24 + $0x8] sm:$0xff]  ;;  %v782_v31 = vmul.f32 %v2010_v47, %v2010_v47  ;;  %v781_v32 = vmul.f32 %v1998_v38, %v1998_v38 }
 0x124   : > { %v717_v41 = vmul.f32 %v701_v39, %v1998_v38  ;;  %v745_v45 = vsel %vm664_vm1, %v721_v36, 0.0  ;;  %v739_v49 = vsel %vm664_vm1, %v719_v40, 0.0  ;;  %v720_v52 = vmul.f32 %v704_v46, %v2006_v44  ;;  %v2021_v57 = vld [vmem:[#allocation2 + $0x40] sm:$0xff]  ;;  %v2024_v59 = vld [vmem:[#allocation2 + $0x38] sm:$0xff]  ;;  %v2027_v61 = vld [vmem:[#allocation2 + $0x30] sm:$0xff] }
 0x125   : > { %746 = vadd.xlane.f32.xlu2 %v745_v45  ;;  %740 = vadd.xlane.f32.xlu1 %v739_v49  ;;  %v718_v53 = vmul.f32 %v702_v48, %v2010_v47  ;;  %v748_v54 = vsel %vm664_vm1, %v722_v51, 0.0  ;;  %v709_v58 = vld [vmem:[%s1912_s24 + $0x40] sm:$0xff]  ;;  %v708_v60 = vld [vmem:[%s1912_s24 + $0x38] sm:$0xff]  ;;  %v707_v62 = vld [vmem:[%s1912_s24 + $0x30] sm:$0xff]  ;;  %v800_v36 = vsel %vm664_vm1, %v782_v31, 0.0  ;;  %v797_v37 = vsel %vm664_vm1, %v781_v32, 0.0 }
 0x126   : > { %v733_v50 = vsel %vm664_vm1, %v717_v41, 0.0  ;;  %v742_v55 = vsel %vm664_vm1, %v720_v52, 0.0  ;;  %v725_v63 = vmul.f32 %v709_v58, %v2021_v57  ;;  %v724_v0 = vmul.f32 %v708_v60, %v2024_v59  ;;  %v2036_v5 = vld [vmem:[#allocation2 + $0x58] sm:$0xff]  ;;  %v2039_v7 = vld [vmem:[#allocation2 + $0x50] sm:$0xff]  ;;  %v2042_v9 = vld [vmem:[#allocation2 + $0x48] sm:$0xff] }
 0x127   : > { %734 = vadd.xlane.f32.xlu0 %v733_v50  ;;  %v736_v56 = vsel %vm664_vm1, %v718_v53, 0.0  ;;  %v723_v1 = vmul.f32 %v707_v62, %v2027_v61  ;;  %v712_v6 = vld [vmem:[%s1912_s24 + $0x58] sm:$0xff]  ;;  %v711_v8 = vld [vmem:[%s1912_s24 + $0x50] sm:$0xff]  ;;  %v710_v10 = vld [vmem:[%s1912_s24 + $0x48] sm:$0xff]  ;;  %v785_v40 = vmul.f32 %v1991_v33, %v1991_v33  ;;  %v784_v41 = vmul.f32 %v2006_v44, %v2006_v44 }
 0x128   : > { %v757_v2 = vsel %vm664_vm1, %v725_v63, 0.0  ;;  %v754_v3 = vsel %vm664_vm1, %v724_v0, 0.0  ;;  %v728_v11 = vmul.f32 %v712_v6, %v2036_v5  ;;  %v727_v12 = vmul.f32 %v711_v8, %v2039_v7  ;;  %v2051_v17 = vld [vmem:[#allocation2 + $0x70] sm:$0xff]  ;;  %v2054_v19 = vld [vmem:[#allocation2 + $0x68] sm:$0xff]  ;;  %v2057_v21 = vld [vmem:[#allocation2 + $0x60] sm:$0xff] }
 0x129   : > { %v751_v4 = vsel %vm664_vm1, %v723_v1, 0.0  ;;  %v726_v13 = vmul.f32 %v710_v10, %v2042_v9  ;;  %v715_v18 = vld [vmem:[%s1912_s24 + $0x70] sm:$0xff]  ;;  %v714_v20 = vld [vmem:[%s1912_s24 + $0x68] sm:$0xff]  ;;  %v713_v22 = vld [vmem:[%s1912_s24 + $0x60] sm:$0xff]  ;;  %v809_v45 = vsel %vm664_vm1, %v785_v40, 0.0  ;;  %v806_v46 = vsel %vm664_vm1, %v784_v41, 0.0 }
 0x12a   : > { %v766_v14 = vsel %vm664_vm1, %v728_v11, 0.0  ;;  %v763_v15 = vsel %vm664_vm1, %v727_v12, 0.0  ;;  %v731_v23 = vmul.f32 %v715_v18, %v2051_v17  ;;  %v730_v24 = vmul.f32 %v714_v20, %v2054_v19  ;;  %v2066_v29 = vld [vmem:[#allocation2 + $0x78] sm:$0xff] }
 0x12b   : > { %v760_v16 = vsel %vm664_vm1, %v726_v13, 0.0  ;;  %v729_v25 = vmul.f32 %v713_v22, %v2057_v21  ;;  %v716_v30 = vld [vmem:[%s1912_s24 + $0x78] sm:$0xff]  ;;  %v803_v48 = vsel %vm664_vm1, %v783_v43, 0.0  ;;  %v788_v49 = vmul.f32 %v2024_v59, %v2024_v59 }
 0x12c   : > { %v775_v26 = vsel %vm664_vm1, %v731_v23, 0.0  ;;  %v772_v27 = vsel %vm664_vm1, %v730_v24, 0.0  ;;  %v732_v34 = vmul.f32 %v716_v30, %v2066_v29  ;;  %v787_v50 = vmul.f32 %v2027_v61, %v2027_v61 }
 0x12d   : > { %749 = vadd.xlane.f32.xlu2 %v748_v54  ;;  %743 = vadd.xlane.f32.xlu1 %v742_v55  ;;  %v769_v28 = vsel %vm664_vm1, %v729_v25, 0.0  ;;  %v786_v51 = vmul.f32 %v2003_v42, %v2003_v42  ;;  %v818_v52 = vsel %vm664_vm1, %v788_v49, 0.0  ;;  %v791_v55 = vmul.f32 %v2039_v7, %v2039_v7 }
 0x12e   : > { %v778_v39 = vsel %vm664_vm1, %v732_v34, 0.0  ;;  %v815_v53 = vsel %vm664_vm1, %v787_v50, 0.0  ;;  %v789_v58 = vmul.f32 %v2021_v57, %v2021_v57  ;;  %v794_v0 = vmul.f32 %v2054_v19, %v2054_v19 }
 0x12f   : > { %737 = vadd.xlane.f32.xlu0 %v736_v56  ;;  %v812_v54 = vsel %vm664_vm1, %v786_v51, 0.0  ;;  %v790_v56 = vmul.f32 %v2042_v9, %v2042_v9  ;;  %v827_v60 = vsel %vm664_vm1, %v791_v55, 0.0  ;;  %v793_v1 = vmul.f32 %v2057_v21, %v2057_v21 }
 0x130   : > { %v821_v63 = vsel %vm664_vm1, %v789_v58, 0.0  ;;  %v796_v8 = vmul.f32 %v2066_v29, %v2066_v29  ;;  %v795_v10 = vmul.f32 %v2051_v17, %v2051_v17  ;;  %v1741_v32 = vmov 0  }
 0x131   : > { %v824_v62 = vsel %vm664_vm1, %v790_v56, 0.0  ;;  %1594 = vset.pattern.permute.xlu0 %v1741_v32  ;;  %1593 = vset.pattern.permute.xlu2 %v1741_v32 }
 0x132   : > { %v842_v11 = vsel %vm664_vm1, %v796_v8, 0.0  ;;  %v839_v12 = vsel %vm664_vm1, %v795_v10, 0.0  ;;  %1595 = vset.pattern.permute.xlu1 %v1741_v32 }
 0x135   : > { %758 = vadd.xlane.f32.xlu2 %v757_v2  ;;  %755 = vadd.xlane.f32.xlu1 %v754_v3  ;;  %v792_v2 = vmul.f32 %v2036_v5, %v2036_v5  ;;  %v836_v3 = vsel %vm664_vm1, %v794_v0, 0.0 }
 0x137   : > { %752 = vadd.xlane.f32.xlu0 %v751_v4  ;;  %v833_v4 = vsel %vm664_vm1, %v793_v1, 0.0  ;;  %v830_v6 = vsel %vm664_vm1, %v792_v2, 0.0 }
 0x13d   : > { %767 = vadd.xlane.f32.xlu2 %v766_v14  ;;  %764 = vadd.xlane.f32.xlu1 %v763_v15 }
 0x13f   : > { %761 = vadd.xlane.f32.xlu0 %v760_v16 }
 0x145   : > { %776 = vadd.xlane.f32.xlu2 %v775_v26  ;;  %773 = vadd.xlane.f32.xlu1 %v772_v27 }
 0x147   : > { %770 = vadd.xlane.f32.xlu0 %v769_v28 }
 0x14d   : > { %801 = vadd.xlane.f32.xlu2 %v800_v36  ;;  %798 = vadd.xlane.f32.xlu1 %v797_v37 }
 0x14f   : > { %779 = vadd.xlane.f32.xlu0 %v778_v39 }
 0x155   : > { %810 = vadd.xlane.f32.xlu2 %v809_v45  ;;  %807 = vadd.xlane.f32.xlu1 %v806_v46 }
 0x157   : > { %804 = vadd.xlane.f32.xlu0 %v803_v48 }
 0x15d   : > { %819 = vadd.xlane.f32.xlu2 %v818_v52  ;;  %816 = vadd.xlane.f32.xlu1 %v815_v53 }
 0x15f   : > { %813 = vadd.xlane.f32.xlu0 %v812_v54 }
 0x165   : > { %828 = vadd.xlane.f32.xlu2 %v827_v60  ;;  %825 = vadd.xlane.f32.xlu1 %v824_v62 }
 0x167   : > { %822 = vadd.xlane.f32.xlu0 %v821_v63 }
 0x16d   : > { %837 = vadd.xlane.f32.xlu2 %v836_v3  ;;  %834 = vadd.xlane.f32.xlu1 %v833_v4 }
 0x16f   : > { %831 = vadd.xlane.f32.xlu0 %v830_v6 }
 0x175   : > { %843 = vadd.xlane.f32.xlu1 %v842_v11 }
 0x177   : > { %840 = vadd.xlane.f32.xlu0 %v839_v12 }
 0x198   : > { %v2119_v13 = vpop.xlane.xlu2 %746  ;;  %v2121_v14 = vpop.xlane.xlu1 %740 }
 0x19a   : > { %v2123_v15 = vpop.xlane.xlu0 %734 }
 0x1a0   : > { %v2125_v16 = vpop.xlane.xlu2 %749  ;;  %v2127_v18 = vpop.xlane.xlu1 %743 }
 0x1a2   : > { %v2129_v20 = vpop.xlane.xlu0 %737 }
 0x1a8   : > { %v2131_v22 = vpop.xlane.xlu2 %758  ;;  %v2133_v23 = vpop.xlane.xlu1 %755 }
 0x1aa   : > { %v2135_v24 = vpop.xlane.xlu0 %752 }
 0x1b0   : > { %v2137_v25 = vpop.xlane.xlu2 %767  ;;  %v2139_v26 = vpop.xlane.xlu1 %764 }
 0x1b2   : > { %v2141_v27 = vpop.xlane.xlu0 %761 }
 0x1b8   : > { %v2143_v28 = vpop.xlane.xlu2 %776  ;;  %v2145_v30 = vpop.xlane.xlu1 %773 }
 0x1ba   : > { %v2147_v31 = vpop.xlane.xlu0 %770 }
 0x1c0   : > { %v802_v34 = vpop.xlane.xlu2 %801  ;;  %v799_v36 = vpop.xlane.xlu1 %798 }
 0x1c1   : > { %1596 = vrsqrt.f32 %v802_v34  ;;  %vm851_vm2 = vweird.f32 %v799_v36  ;;  %vm861_vm4 = vweird.f32 %v802_v34 }
 0x1c2   : > { %v2149_v37 = vpop.xlane.xlu0 %779  ;;  %1598 = vrsqrt.f32 %v799_v36 }
 0x1c7   : > { %v1597_v39 = vpop.eup %1596 }
 0x1c8   : > { %v1599_v40 = vpop.eup %1598  ;;  %v856_v41 = vmul.f32 %v1597_v39, %v802_v34  ;;  %v2151_v43 = vpop.xlane.xlu2 %810  ;;  %vm862_vm5 = vweird.f32 %v1597_v39 }
 0x1c9   : > { %v846_v45 = vmul.f32 %v1599_v40, %v799_v36  ;;  %1600 = vrsqrt.f32 %v2151_v43  ;;  %v808_v46 = vpop.xlane.xlu1 %807  ;;  %vm852_vm3 = vweird.f32 %v1599_v40  ;;  %vm2176_vm7 = vmor %vm861_vm4, %vm862_vm5  ;;  %vm891_vm14 = vweird.f32 %v2151_v43 }
 0x1ca   : > { %v2154_v48 = vpop.xlane.xlu0 %804  ;;  %v857_v49 = vmul.f32 %v1597_v39, %v856_v41  ;;  %1602 = vrsqrt.f32 %v808_v46  ;;  %vm853_vm6 = vmor %vm851_vm2, %vm852_vm3  ;;  %vm881_vm8 = vweird.f32 %v808_v46 }
 0x1cb   : > { %v847_v50 = vmul.f32 %v1599_v40, %v846_v45  ;;  %1604 = vrsqrt.f32 %v2154_v48  ;;  %vm871_vm12 = vweird.f32 %v2154_v48 }
 0x1cc   : > { %v858_v51 = vmul.f32 0.5, %v857_v49  ;;  %v1037_v49 = vld [vmem:[%s1917_s20] sm:$0xff] }
 0x1cd   : > { %v848_v52 = vmul.f32 0.5, %v847_v50 }
 0x1ce   : > { %v859_v53 = vsub.f32 1.5, %v858_v51 }
 0x1cf   : > { %v2157_v54 = vpop.eup %1600  ;;  %v849_v55 = vsub.f32 1.5, %v848_v52 }
 0x1d0   : > { %v2159_v56 = vpop.eup %1602  ;;  %v860_v58 = vmul.f32 %v1597_v39, %v859_v53  ;;  %v886_v60 = vmul.f32 %v2157_v54, %v2151_v43  ;;  %v2163_v62 = vpop.xlane.xlu2 %819  ;;  %vm892_vm15 = vweird.f32 %v2157_v54 }
 0x1d1   : > { %v2165_v63 = vpop.eup %1604  ;;  %v850_v0 = vmul.f32 %v1599_v40, %v849_v55  ;;  %v876_v1 = vmul.f32 %v2159_v56, %v808_v46  ;;  %1606 = vrsqrt.f32 %v2163_v62  ;;  %v2169_v2 = vpop.xlane.xlu1 %816  ;;  %vm882_vm9 = vweird.f32 %v2159_v56  ;;  %vm2245_vm2 = vmor %vm891_vm14, %vm892_vm15 }
 0x1d2   : > { %v2171_v3 = vpop.xlane.xlu0 %813  ;;  %v887_v4 = vmul.f32 %v2157_v54, %v886_v60  ;;  %v866_v6 = vmul.f32 %v2165_v63, %v2154_v48  ;;  %v864_v12 = vsel %vm2176_vm7, %v1597_v39, %v860_v58  ;;  %1608 = vrsqrt.f32 %v2169_v2  ;;  %vm2196_vm10 = vmor %vm881_vm8, %vm882_vm9 }
 0x1d3   : > { %v854_v10 = vsel %vm853_vm6, %v1599_v40, %v850_v0  ;;  %v877_v11 = vmul.f32 %v2159_v56, %v876_v1  ;;  %1610 = vrsqrt.f32 %v2171_v3  ;;  %v1006_v51 = vmin.f32 %v864_v12, 1e+08 }
 0x1d4   : > { %v1005_v32 = vmin.f32 %v854_v10, 1e+08  ;;  %v867_v34 = vmul.f32 %v2165_v63, %v866_v6  ;;  %v888_v41 = vmul.f32 0.5, %v887_v4  ;;  %vm872_vm11 = vweird.f32 %v2165_v63 }
 0x1d5   : > { %v878_v36 = vmul.f32 0.5, %v877_v11  ;;  %v1022_v11 = vmul.f32 %v1006_v51, %v2129_v20  ;;  %vm2219_vm13 = vmor %vm871_vm12, %vm872_vm11  ;;  %vm911_vm0 = vweird.f32 %v2169_v2  ;;  %vm901_vm3 = vweird.f32 %v2171_v3 }
 0x1d6   : > { %v868_v45 = vmul.f32 0.5, %v867_v34  ;;  %v1021_v40 = vmul.f32 %v1005_v32, %v2123_v15  ;;  %v889_v4 = vsub.f32 1.5, %v888_v41  ;;  %vm921_vm6 = vweird.f32 %v2163_v62 }
 0x1d7   : > { %v2189_v50 = vpop.eup %1606  ;;  %v879_v39 = vsub.f32 1.5, %v878_v36  ;;  %v1038_v36 = vld [vmem:[%s1917_s20 + $0x8] sm:$0xff] }
 0x1d8   : > { %v869_v52 = vsub.f32 1.5, %v868_v45  ;;  %v916_v53 = vmul.f32 %v2189_v50, %v2163_v62  ;;  %v2193_v55 = vpop.xlane.xlu2 %828  ;;  %v1053_v0 = vmul.f32 %v1037_v49, %v1021_v40  ;;  %v2206_v1 = vpop.eup %1608  ;;  %vm922_vm8 = vweird.f32 %v2189_v50 }
 0x1d9   : > { %v880_v46 = vmul.f32 %v2159_v56, %v879_v39  ;;  %1612 = vrsqrt.f32 %v2193_v55  ;;  %v2202_v15 = vpop.xlane.xlu1 %825  ;;  %v1611_v8 = vpop.eup %1610  ;;  %v906_v10 = vmul.f32 %v2206_v1, %v2169_v2  ;;  %v1054_v39 = vmul.f32 %v1038_v36, %v1022_v11  ;;  %vm2311_vm14 = vmor %vm921_vm6, %vm922_vm8 }
 0x1da   : > { %v2204_v60 = vpop.xlane.xlu0 %822  ;;  %v870_v6 = vmul.f32 %v2165_v63, %v869_v52  ;;  %1614 = vrsqrt.f32 %v2202_v15  ;;  %1071 = vperm.xlu2 %1593, %v1053_v0   ;;  %v917_v34 = vmul.f32 %v2189_v50, %v916_v53  ;;  %v896_v48 = vmul.f32 %v1611_v8, %v2171_v3 }
 0x1db   : > { %v884_v12 = vsel %vm2196_vm10, %v2159_v56, %v880_v46  ;;  %v907_v41 = vmul.f32 %v2206_v1, %v906_v10  ;;  %v890_v56 = vmul.f32 %v2157_v54, %v889_v4  ;;  %1616 = vrsqrt.f32 %v2204_v60  ;;  %1076 = vperm.xlu0 %1594, %v1054_v39  }
 0x1dc   : > { %v874_v20 = vsel %vm2219_vm13, %v2165_v63, %v870_v6  ;;  %v897_v45 = vmul.f32 %v1611_v8, %v896_v48  ;;  %v1008_v49 = vmin.f32 %v884_v12, 1e+08  ;;  %v918_v63 = vmul.f32 0.5, %v917_v34 }
 0x1dd   : > { %v908_v51 = vmul.f32 0.5, %v907_v41  ;;  %v1007_v53 = vmin.f32 %v874_v20, 1e+08  ;;  %v894_v43 = vsel %vm2245_vm2, %v2157_v54, %v890_v56  ;;  %vm902_vm4 = vweird.f32 %v1611_v8  ;;  %v1040_v54 = vld [vmem:[%s1917_s20 + $0x18] sm:$0xff] }
 0x1de   : > { %v898_v46 = vmul.f32 0.5, %v897_v45  ;;  %vm912_vm5 = vweird.f32 %v2206_v1  ;;  %v1024_v36 = vmul.f32 %v1008_v49, %v2127_v18  ;;  %v919_v41 = vsub.f32 1.5, %v918_v63  ;;  %vm903_vm7 = vmor %vm901_vm3, %vm902_vm4  ;;  %v1039_v18 = vld [vmem:[%s1917_s20 + $0x10] sm:$0xff] }
 0x1df   : > { %v2234_v40 = vpop.eup %1612  ;;  %v909_v6 = vsub.f32 1.5, %v908_v51  ;;  %v1023_v56 = vmul.f32 %v1007_v53, %v2121_v14  ;;  %vm2282_vm9 = vmor %vm911_vm0, %vm912_vm5  ;;  %v1009_v3 = vmin.f32 %v894_v43, 1e+08  ;;  %vm951_vm10 = vweird.f32 %v2193_v55 }
 0x1e0   : > { %v2237_v52 = vpop.eup %1614  ;;  %v946_v58 = vmul.f32 %v2234_v40, %v2193_v55  ;;  %v2241_v0 = vpop.xlane.xlu2 %837  ;;  %v899_v32 = vsub.f32 1.5, %v898_v46  ;;  %vm941_vm11 = vweird.f32 %v2202_v15  ;;  %vm931_vm12 = vweird.f32 %v2204_v60 }
 0x1e1   : > { %v936_v10 = vmul.f32 %v2237_v52, %v2202_v15  ;;  %1618 = vrsqrt.f32 %v2241_v0  ;;  %v2253_v11 = vpop.xlane.xlu1 %834  ;;  %v2265_v20 = vpop.eup %1616  ;;  %v910_v51 = vmul.f32 %v2206_v1, %v909_v6  ;;  %v1056_v6 = vmul.f32 %v1040_v54, %v1024_v36 }
 0x1e2   : > { %v2255_v12 = vpop.xlane.xlu0 %831  ;;  %v947_v34 = vmul.f32 %v2234_v40, %v946_v58  ;;  %1620 = vrsqrt.f32 %v2253_v11  ;;  %v900_v45 = vmul.f32 %v1611_v8, %v899_v32  ;;  %v926_v39 = vmul.f32 %v2265_v20, %v2204_v60 }
 0x1e3   : > { %v937_v48 = vmul.f32 %v2237_v52, %v936_v10  ;;  %1622 = vrsqrt.f32 %v2255_v12  ;;  %v920_v10 = vmul.f32 %v2189_v50, %v919_v41  ;;  %v1055_v2 = vmul.f32 %v1039_v18, %v1023_v56  ;;  %1086 = vperm.xlu2 %1593, %v1056_v6  }
 0x1e4   : > { %v904_v14 = vsel %vm903_vm7, %v1611_v8, %v900_v45  ;;  %v948_v53 = vmul.f32 0.5, %v947_v34  ;;  %v927_v4 = vmul.f32 %v2265_v20, %v926_v39  ;;  %v914_v8 = vsel %vm2282_vm9, %v2206_v1, %v910_v51 }
 0x1e5   : > { %v938_v63 = vmul.f32 0.5, %v937_v48  ;;  %v1010_v58 = vmin.f32 %v904_v14, 1e+08  ;;  %vm932_vm13 = vweird.f32 %v2265_v20  ;;  %1081 = vperm.xlu1 %1595, %v1055_v2   ;;  %v1025_v18 = vmul.f32 %v1009_v3, %v2119_v13 }
 0x1e6   : > { %v928_v34 = vmul.f32 0.5, %v927_v4  ;;  %v949_v36 = vsub.f32 1.5, %v948_v53  ;;  %v924_v14 = vsel %vm2311_vm14, %v2189_v50, %v920_v10  ;;  %vm952_vm15 = vweird.f32 %v2234_v40  ;;  %v1041_v53 = vld [vmem:[%s1917_s20 + $0x20] sm:$0xff]  ;;  %vm933_vm2 = vmor %vm931_vm12, %vm932_vm13 }
 0x1e7   : > { %v2286_v46 = vpop.eup %1618  ;;  %v939_v41 = vsub.f32 1.5, %v938_v63  ;;  %v1026_v49 = vmul.f32 %v1010_v58, %v2125_v16  ;;  %vm942_vm0 = vweird.f32 %v2237_v52  ;;  %v1042_v63 = vld [vmem:[%s1917_s20 + $0x28] sm:$0xff]  ;;  %v1011_v16 = vmin.f32 %v914_v8, 1e+08  ;;  %vm2355_vm5 = vmor %vm951_vm10, %vm952_vm15  ;;  %v2436_v8 = vld [vmem:[%s1922_s8 + $0x50] sm:$0xff] }
 0x1e8   : > { %v2292_v32 = vpop.eup %1620  ;;  %v976_v43 = vmul.f32 %v2286_v46, %v2241_v0  ;;  %v929_v56 = vsub.f32 1.5, %v928_v34  ;;  %v950_v3 = vmul.f32 %v2234_v40, %v949_v36  ;;  %v1057_v2 = vmul.f32 %v1041_v53, %v1025_v18  ;;  %vm2345_vm3 = vmor %vm941_vm11, %vm942_vm0 }
 0x1e9   : > { %v2300_v48 = vpop.eup %1622  ;;  %v966_v45 = vmul.f32 %v2292_v32, %v2253_v11  ;;  %v2305_v1 = vpop.xlane.xlu1 %843  ;;  %v940_v50 = vmul.f32 %v2237_v52, %v939_v41  ;;  %v1058_v34 = vmul.f32 %v1042_v63, %v1026_v49  ;;  %vm961_vm6 = vweird.f32 %v2255_v12 }
 0x1ea   : > { %v956_v51 = vmul.f32 %v2300_v48, %v2255_v12  ;;  %v2317_v39 = vpop.xlane.xlu0 %840  ;;  %v930_v4 = vmul.f32 %v2265_v20, %v929_v56  ;;  %v977_v6 = vmul.f32 %v2286_v46, %v976_v43  ;;  %1624 = vrsqrt.f32 %v2305_v1 }
 0x1eb   : > { %v967_v62 = vmul.f32 %v2292_v32, %v966_v45  ;;  %1626 = vrsqrt.f32 %v2317_v39  ;;  %v1012_v43 = vmin.f32 %v924_v14, 1e+08  ;;  %vm962_vm4 = vweird.f32 %v2300_v48  ;;  %1091 = vperm.xlu2 %1593, %v1057_v2  }
 0x1ec   : > { %v957_v13 = vmul.f32 %v2300_v48, %v956_v51  ;;  %v934_v58 = vsel %vm933_vm2, %v2265_v20, %v930_v4  ;;  %v978_v60 = vmul.f32 0.5, %v977_v6  ;;  %v1045_v20 = vld [vmem:[%s1917_s20 + $0x40] sm:$0xff]  ;;  %v954_v51 = vsel %vm2355_vm5, %v2234_v40, %v950_v3  ;;  %vm963_vm7 = vmor %vm961_vm6, %vm962_vm4  ;;  %v1044_v6 = vld [vmem:[%s1917_s20 + $0x38] sm:$0xff] }
 0x1ed   : > { %v1013_v36 = vmin.f32 %v934_v58, 1e+08  ;;  %v968_v41 = vmul.f32 0.5, %v967_v62  ;;  %1096 = vperm.xlu1 %1595, %v1058_v34   ;;  %v944_v55 = vsel %vm2345_vm3, %v2237_v52, %v940_v50  ;;  %v1027_v49 = vmul.f32 %v1011_v16, %v2135_v24  ;;  %v1043_v62 = vld [vmem:[%s1917_s20 + $0x30] sm:$0xff] }
 0x1ee   : > { %v958_v10 = vmul.f32 0.5, %v957_v13  ;;  %v1028_v53 = vmul.f32 %v1012_v43, %v2133_v23  ;;  %v979_v40 = vsub.f32 1.5, %v978_v60  ;;  %vm971_vm8 = vweird.f32 %v2253_v11  ;;  %v1048_v23 = vld [vmem:[%s1917_s20 + $0x58] sm:$0xff] }
 0x1ef   : > { %v1029_v15 = vmul.f32 %v1013_v36, %v2131_v22  ;;  %v969_v12 = vsub.f32 1.5, %v968_v41  ;;  %vm972_vm9 = vweird.f32 %v2292_v32  ;;  %v1015_v16 = vmin.f32 %v954_v51, 1e+08 }
 0x1f0   : > { %v959_v45 = vsub.f32 1.5, %v958_v10  ;;  %v2361_v56 = vpop.eup %1624  ;;  %v1014_v3 = vmin.f32 %v944_v55, 1e+08  ;;  %v1059_v58 = vmul.f32 %v1043_v62, %v1027_v49  ;;  %v980_v43 = vmul.f32 %v2286_v46, %v979_v40  ;;  %vm2391_vm12 = vmor %vm971_vm8, %vm972_vm9  ;;  %v1050_v40 = vld [vmem:[%s1917_s20 + $0x68] sm:$0xff] }
 0x1f1   : > { %v1627_v14 = vpop.eup %1626  ;;  %v996_v22 = vmul.f32 %v2361_v56, %v2305_v1  ;;  %v1061_v63 = vmul.f32 %v1045_v20, %v1029_v15  ;;  %v970_v10 = vmul.f32 %v2292_v32, %v969_v12  ;;  %vm981_vm10 = vweird.f32 %v2241_v0  ;;  %v1046_v20 = vld [vmem:[%s1917_s20 + $0x48] sm:$0xff] }
 0x1f2   : > { %v960_v18 = vmul.f32 %v2300_v48, %v959_v45  ;;  %v986_v52 = vmul.f32 %v1627_v14, %v2317_v39  ;;  %vm982_vm11 = vweird.f32 %v2286_v46  ;;  %vm992_vm13 = vweird.f32 %v1627_v14 }
 0x1f3   : > { %v997_v13 = vmul.f32 %v2361_v56, %v996_v22  ;;  %1111 = vperm.xlu0 %1594, %v1061_v63   ;;  %1101 = vperm.xlu2 %1593, %v1059_v58   ;;  %v1030_v60 = vmul.f32 %v1014_v3, %v2141_v27  ;;  %vm2396_vm14 = vmor %vm981_vm10, %vm982_vm11  ;;  %v974_v11 = vsel %vm2391_vm12, %v2292_v32, %v970_v10  ;;  %vm991_vm15 = vweird.f32 %v2317_v39  ;;  %v1047_v27 = vld [vmem:[%s1917_s20 + $0x50] sm:$0xff]  ;;  %v1190_v58 = vld [vmem:[%s1922_s8 + $0x48] sm:$0xff] }
 0x1f4   : > { %v964_v4 = vsel %vm963_vm7, %v2300_v48, %v960_v18  ;;  %v987_v50 = vmul.f32 %v1627_v14, %v986_v52  ;;  %v1060_v48 = vmul.f32 %v1044_v6, %v1028_v53  ;;  %v1031_v54 = vmul.f32 %v1015_v16, %v2139_v26  ;;  %vm993_vm3 = vmor %vm991_vm15, %vm992_vm13  ;;  %v1051_v39 = vld [vmem:[%s1917_s20 + $0x70] sm:$0xff]  ;;  %v1181_v6 = vld [vmem:[%s1922_s8] sm:$0xff] }
 0x1f5   : > { %v1016_v24 = vmin.f32 %v964_v4, 1e+08  ;;  %v998_v2 = vmul.f32 0.5, %v997_v13  ;;  %v984_v15 = vsel %vm2396_vm14, %v2286_v46, %v980_v43  ;;  %vm1001_vm0 = vweird.f32 %v2305_v1  ;;  %v1184_v13 = vld [vmem:[%s1922_s8 + $0x18] sm:$0xff]  ;;  %v1185_v16 = vld [vmem:[%s1922_s8 + $0x20] sm:$0xff]  ;;  %v1187_v3 = vld [vmem:[%s1922_s8 + $0x30] sm:$0xff] }
 0x1f6   : > { %v988_v36 = vmul.f32 0.5, %v987_v50  ;;  %1106 = vperm.xlu1 %1595, %v1060_v48   ;;  %vm1002_vm2 = vweird.f32 %v2361_v56  ;;  %v1017_v32 = vmin.f32 %v974_v11, 1e+08  ;;  %v1062_v26 = vmul.f32 %v1046_v20, %v1030_v60  ;;  %v1182_v50 = vld [vmem:[%s1922_s8 + $0x8] sm:$0xff]  ;;  %v1189_v43 = vld [vmem:[%s1922_s8 + $0x40] sm:$0xff] }
 0x1f7   : > { %v1032_v34 = vmul.f32 %v1016_v24, %v2137_v25  ;;  %v999_v45 = vsub.f32 1.5, %v998_v2  ;;  %v1018_v18 = vmin.f32 %v984_v15, 1e+08  ;;  %v1063_v12 = vmul.f32 %v1047_v27, %v1031_v54  ;;  %vm1003_vm4 = vmor %vm1001_vm0, %vm1002_vm2  ;;  %v1186_v10 = vld [vmem:[%s1922_s8 + $0x28] sm:$0xff]  ;;  %v1196_v2 = vld [vmem:[%s1922_s8 + $0x78] sm:$0xff] }
 0x1f8   : > { %v989_v25 = vsub.f32 1.5, %v988_v36  ;;  %v1033_v22 = vmul.f32 %v1017_v32, %v2147_v31  ;;  %v2439_v36 = vld [vmem:[%s1922_s8 + $0x58] sm:$0xff] }
 0x1f9   : > { %v1064_v41 = vmul.f32 %v1048_v23, %v1032_v34  ;;  %v1000_v49 = vmul.f32 %v2361_v56, %v999_v45  ;;  %v1034_v53 = vmul.f32 %v1018_v18, %v2145_v30  ;;  %v1052_v30 = vld [vmem:[%s1917_s20 + $0x78] sm:$0xff]  ;;  %v1183_v23 = vld [vmem:[%s1922_s8 + $0x10] sm:$0xff] }
 0x1fa   : > { %v990_v51 = vmul.f32 %v1627_v14, %v989_v25  ;;  %v1188_v34 = vld [vmem:[%s1922_s8 + $0x38] sm:$0xff]  ;;  %v2445_v25 = vld [vmem:[%s1922_s8 + $0x70] sm:$0xff] }
 0x1fb   : > { %1126 = vperm.xlu0 %1594, %v1064_v41   ;;  %1116 = vperm.xlu2 %1593, %v1062_v26   ;;  %v1004_v62 = vsel %vm1003_vm4, %v2361_v56, %v1000_v49  ;;  %v2442_v41 = vld [vmem:[%s1922_s8 + $0x68] sm:$0xff] }
 0x1fc   : > { %v994_v55 = vsel %vm993_vm3, %v1627_v14, %v990_v51  ;;  %v1049_v14 = vld [vmem:[%s1917_s20 + $0x60] sm:$0xff]  ;;  %v1020_v4 = vmin.f32 %v1004_v62, 1e+08 }
 0x1fd   : > { %v1019_v46 = vmin.f32 %v994_v55, 1e+08  ;;  %v1065_v52 = vmul.f32 %v1049_v14, %v1033_v22 }
 0x1fe   : > { %1121 = vperm.xlu1 %1595, %v1063_v12   ;;  %v1036_v31 = vmul.f32 %v1020_v4, %v2149_v37  ;;  %v1193_v37 = vld [vmem:[%s1922_s8 + $0x60] sm:$0xff] }
 0x1ff   : > { %v1035_v1 = vmul.f32 %v1019_v46, %v2143_v28  ;;  %v1066_v28 = vmul.f32 %v1050_v40, %v1034_v53 }
 0x200   : > { %v1068_v56 = vmul.f32 %v1052_v30, %v1036_v31 }
 0x201   : > { %v1067_v63 = vmul.f32 %v1051_v39, %v1035_v1 }
 0x203   : > { %1141 = vperm.xlu0 %1594, %v1067_v63   ;;  %1131 = vperm.xlu2 %1593, %v1065_v52  }
 0x206   : > { %1136 = vperm.xlu1 %1595, %v1066_v28  }
 0x20b   : > { %1146 = vperm.xlu2 %1593, %v1068_v56  }
 0x234   : > { %v1072_v24 = vpop.permute.xlu2 %1071 }
 0x235   : > { %v1149_v48 = vmul.f32 %v1072_v24, %v1998_v38 }
 0x237   : > { %1165 = vst.msk [vmem:[%s1931_s28] sm:$0xff] %vm664_vm1, %v1149_v48  ;;  %v1197_v60 = vadd.f32 %v1181_v6, %v1149_v48 }
 0x239   : > { %1213 = vst.msk [vmem:[%s1927_s16] sm:$0xff] %vm664_vm1, %v1197_v60 }
 0x23d   : > { %v1087_v0 = vpop.permute.xlu2 %1086 }
 0x23e   : > { %v1152_v38 = vmul.f32 %v1087_v0, %v2006_v44 }
 0x240   : > { %1168 = vst.msk [vmem:[%s1931_s28 + $0x18] sm:$0xff] %vm664_vm1, %v1152_v38  ;;  %v1200_v11 = vadd.f32 %v1184_v13, %v1152_v38 }
 0x242   : > { %1216 = vst.msk [vmem:[%s1927_s16 + $0x18] sm:$0xff] %vm664_vm1, %v1200_v11 }
 0x245   : > { %v1092_v45 = vpop.permute.xlu2 %1091 }
 0x246   : > { %v1153_v20 = vmul.f32 %v1092_v45, %v1991_v33 }
 0x248   : > { %1169 = vst.msk [vmem:[%s1931_s28 + $0x20] sm:$0xff] %vm664_vm1, %v1153_v20  ;;  %v1201_v54 = vadd.f32 %v1185_v16, %v1153_v20 }
 0x24a   : > { %1217 = vst.msk [vmem:[%s1927_s16 + $0x20] sm:$0xff] %vm664_vm1, %v1201_v54 }
 0x24d   : > { %v1102_v15 = vpop.permute.xlu2 %1101  ;;  %v1077_v44 = vpop.permute.xlu0 %1076 }
 0x24e   : > { %v1155_v51 = vmul.f32 %v1102_v15, %v2027_v61  ;;  %v1150_v27 = vmul.f32 %v1077_v44, %v2010_v47 }
 0x250   : > { %1171 = vst.msk [vmem:[%s1931_s28 + $0x30] sm:$0xff] %vm664_vm1, %v1155_v51  ;;  %v1203_v32 = vadd.f32 %v1187_v3, %v1155_v51  ;;  %v1198_v55 = vadd.f32 %v1182_v50, %v1150_v27 }
 0x251   : > { %1166 = vst.msk [vmem:[%s1931_s28 + $0x8] sm:$0xff] %vm664_vm1, %v1150_v27 }
 0x252   : > { %1214 = vst.msk [vmem:[%s1927_s16 + $0x8] sm:$0xff] %vm664_vm1, %v1198_v55 }
 0x253   : > { %1219 = vst.msk [vmem:[%s1927_s16 + $0x30] sm:$0xff] %vm664_vm1, %v1203_v32 }
 0x255   : > { %v1117_v33 = vpop.permute.xlu2 %1116 }
 0x256   : > { %v1158_v26 = vmul.f32 %v1117_v33, %v2042_v9 }
 0x257   : > { %v1082_v61 = vpop.permute.xlu1 %1081 }
 0x258   : > { %v1151_v18 = vmul.f32 %v1082_v61, %v1994_v35  ;;  %1174 = vst.msk [vmem:[%s1931_s28 + $0x48] sm:$0xff] %vm664_vm1, %v1158_v26  ;;  %v1206_v47 = vadd.f32 %v1190_v58, %v1158_v26 }
 0x25a   : > { %1167 = vst.msk [vmem:[%s1931_s28 + $0x10] sm:$0xff] %vm664_vm1, %v1151_v18  ;;  %v1199_v49 = vadd.f32 %v1183_v23, %v1151_v18 }
 0x25b   : > { %1222 = vst.msk [vmem:[%s1927_s16 + $0x48] sm:$0xff] %vm664_vm1, %v1206_v47 }
 0x25c   : > { %1215 = vst.msk [vmem:[%s1927_s16 + $0x10] sm:$0xff] %vm664_vm1, %v1199_v49 }
 0x25d   : > { %v1132_v46 = vpop.permute.xlu2 %1131 }
 0x25e   : > { %v1161_v12 = vmul.f32 %v1132_v46, %v2057_v21 }
 0x25f   : > { %v1097_v9 = vpop.permute.xlu1 %1096 }
 0x260   : > { %v1154_v35 = vmul.f32 %v1097_v9, %v2003_v42  ;;  %1177 = vst.msk [vmem:[%s1931_s28 + $0x60] sm:$0xff] %vm664_vm1, %v1161_v12  ;;  %v1209_v39 = vadd.f32 %v1193_v37, %v1161_v12 }
 0x262   : > { %1170 = vst.msk [vmem:[%s1931_s28 + $0x28] sm:$0xff] %vm664_vm1, %v1154_v35  ;;  %v1202_v1 = vadd.f32 %v1186_v10, %v1154_v35 }
 0x263   : > { %1225 = vst.msk [vmem:[%s1927_s16 + $0x60] sm:$0xff] %vm664_vm1, %v1209_v39 }
 0x264   : > { %1218 = vst.msk [vmem:[%s1927_s16 + $0x28] sm:$0xff] %vm664_vm1, %v1202_v1 }
 0x265   : > { %v1112_v22 = vpop.permute.xlu0 %1111  ;;  %v1147_v21 = vpop.permute.xlu2 %1146 }
 0x266   : > { %v1157_v62 = vmul.f32 %v1112_v22, %v2021_v57  ;;  %v1164_v14 = vmul.f32 %v1147_v21, %v2066_v29 }
 0x268   : > { %1173 = vst.msk [vmem:[%s1931_s28 + $0x40] sm:$0xff] %vm664_vm1, %v1157_v62  ;;  %v1205_v42 = vadd.f32 %v1189_v43, %v1157_v62  ;;  %v1107_v53 = vpop.permute.xlu1 %1106  ;;  %v1212_v57 = vadd.f32 %v1196_v2, %v1164_v14 }
 0x269   : > { %v1156_v63 = vmul.f32 %v1107_v53, %v2024_v59  ;;  %1180 = vst.msk [vmem:[%s1931_s28 + $0x78] sm:$0xff] %vm664_vm1, %v1164_v14 }
 0x26a   : > { %1221 = vst.msk [vmem:[%s1927_s16 + $0x40] sm:$0xff] %vm664_vm1, %v1205_v42 }
 0x26b   : > { %1172 = vst.msk [vmem:[%s1931_s28 + $0x38] sm:$0xff] %vm664_vm1, %v1156_v63  ;;  %v1204_v40 = vadd.f32 %v1188_v34, %v1156_v63 }
 0x26c   : > { %1228 = vst.msk [vmem:[%s1927_s16 + $0x78] sm:$0xff] %vm664_vm1, %v1212_v57 }
 0x26d   : > { %v1127_v4 = vpop.permute.xlu0 %1126  ;;  %1220 = vst.msk [vmem:[%s1927_s16 + $0x38] sm:$0xff] %vm664_vm1, %v1204_v40 }
 0x26e   : > { %v1160_v29 = vmul.f32 %v1127_v4, %v2036_v5 }
 0x270   : > { %1176 = vst.msk [vmem:[%s1931_s28 + $0x58] sm:$0xff] %vm664_vm1, %v1160_v29  ;;  %v1208_v59 = vadd.f32 %v2439_v36, %v1160_v29  ;;  %v1122_v52 = vpop.permute.xlu1 %1121 }
 0x271   : > { %v1159_v28 = vmul.f32 %v1122_v52, %v2039_v7 }
 0x272   : > { %1224 = vst.msk [vmem:[%s1927_s16 + $0x58] sm:$0xff] %vm664_vm1, %v1208_v59 }
 0x273   : > { %1175 = vst.msk [vmem:[%s1931_s28 + $0x50] sm:$0xff] %vm664_vm1, %v1159_v28  ;;  %v1207_v31 = vadd.f32 %v2436_v8, %v1159_v28 }
 0x275   : > { %v1142_v30 = vpop.permute.xlu0 %1141  ;;  %1223 = vst.msk [vmem:[%s1927_s16 + $0x50] sm:$0xff] %vm664_vm1, %v1207_v31 }
 0x276   : > { %v1163_v5 = vmul.f32 %v1142_v30, %v2051_v17 }
 0x278   : > { %1179 = vst.msk [vmem:[%s1931_s28 + $0x70] sm:$0xff] %vm664_vm1, %v1163_v5  ;;  %v1211_v56 = vadd.f32 %v2445_v25, %v1163_v5  ;;  %v1137_v6 = vpop.permute.xlu1 %1136 }
 0x279   : > { %v1162_v24 = vmul.f32 %v1137_v6, %v2054_v19 }
 0x27a   : > { %1227 = vst.msk [vmem:[%s1927_s16 + $0x70] sm:$0xff] %vm664_vm1, %v1211_v56 }
 0x27b   : > { %1178 = vst.msk [vmem:[%s1931_s28 + $0x68] sm:$0xff] %vm664_vm1, %v1162_v24  ;;  %v1210_v7 = vadd.f32 %v2442_v41, %v1162_v24 }
 0x27d   : > { %1226 = vst.msk [vmem:[%s1927_s16 + $0x68] sm:$0xff] %vm664_vm1, %v1210_v7 }
 0x27e PF: > { %s1477_s0 = sshll.u32 %s1726_s27, 7  ;;  %s1247_s29 = sshll.u32 %s1931_s28, 4  ;;  %s1248_s29 = int_to_ptr.vmem [resolvable:$true] %s1247_s29 }
 0x27f   : > { %s1246_s26 = scalar_lea.hbm %s2586_s5, %s1477_s0  ;;  %s2628_s20 = sand.u32 1, %s1706_s22  }
 0x280   : > { %s1249_s19 = sshll.u32 %s1246_s26, 4  ;;  %s1230_s10 = scalar_lea.sflag [#allocation5], %s2628_s20  ;;  %s1250_s19 = int_to_ptr.hbm [resolvable:$true] %s1249_s19 }
 0x281   : > { %s1642_s13 = sshra.s32 %s1250_s19, 4  ;;  %s1648_s27 = scalar_lea.hbm %s2586_s5, 256  ;;  %s1643_s13 = int_to_ptr.hbm [resolvable:$true] %s1642_s13 }
 0x282   : > { %s1644_s7 = scalar_lea.hbm %s1643_s13, 128  ;;  %p1649_p11 = scmp.lt.s32.totalorder %s1643_s13, %s2586_s5 }
 0x283   : > { %p1645_p8 = scmp.ne.s32.totalorder %s1643_s13, %s1644_s7  ;;  %p1650_p13 = scmp.lt.s32.totalorder %s1648_s27, %s1644_s7 }
 0x285   : > { %p1646_p9 = pnand %p1645_p8, %p1851_p7  ;;  %p1651_p0 = por %p1650_p13, %p1649_p11 }
 0x287   : > { %p1647_p10 = pneg %p1646_p9 }
 0x289   : > { %p1652_p1 = pnand %p1651_p0, %p1647_p10 }
 0x28b   : > { %1655 = shalt.err (!%p1652_p1)
}
 0x28c   : > { %s1742_s8 = smov 128   ;;  %s1743_s17 = smov 8  }
 0x28d   : > { %1502 = dma.vmem_to_hbm [thread:$0]  (%p1851_p7), %s1248_s29, 2048, %s1250_s19, %s1230_s10, %s1742_s8, %s1742_s8, %s1743_s17  }
 0x28e PF: > { %p1508_p2 = scmp.ge.s32.totalorder %s1738_s30, 2  ;;  %s1268_s16 = sand.u32 1, %s1702_s21  }
 0x28f   : > { %s1269_s12 = scalar_lea.sflag [#allocation5], %s1268_s16 }
 0x290   : > { %p1505_p3 = pnand %p1508_p2, %p1859_p12 }
 0x292   : > { %p1506_p4 = pneg %p1505_p3 }
 0x294   : > { %1697 = dma.done.wait (%p1506_p4), %s1269_s12, 2048  }
 0x295   : > { %1699 = vsyncadd (%p1506_p4), %s1269_s12, 4294965248  ;;  %s20_s30 = sadd.s32 1, %s1738_s30   ;;  %s2629_s28 = sld [smem:[#allocation7_spill]] }
 0x296   : > { %p17_p5 = scmp.ge.s32.totalorder %s20_s30, 6   ;;  %s2630_s23 = sld [smem:[#allocation13_spill]] }
 0x297   : > { %s2631_s24 = sld [smem:[#allocation8_spill]]  ;;  %s2637_s21 = smov %s1706_s22 }
 0x298   : > { %s2632_s25 = sld [smem:[#allocation14_spill]] }
 0x299   : > { %s2633_s26 = sld [smem:[#allocation9_spill]] }
 0x29a   : > { %s2634_s27 = sld [smem:[#allocation10_spill]] }
 0x29b   : > { %s2635_s15 = sld [smem:[#allocation11_spill]]  ;;  %s2638_s22 = smov %s2629_s28 }
 0x29c   : > { %s2636_s29 = sld [smem:[#allocation12_spill]] }
 0x29d   :  { %19 = sbr.rel (!%p17_p5) target bundleno = 8 (0x8), region = 153 }
 0x2a1   : > { %s2639_s28 = smov %s2635_s15 }
 0x2a2   :  { %1283 = vsyncpa [#allocation5], 1 }
 0x2a3   :  { %1285 = vsyncpa [#allocation5 + $0x1], 1 }

// kernel: layergcn_forward.6
= control target key start
LH: loop header
LB: loop body
LE: loop exit
PB: predicated region body
PF: predicated region fallthrough
CT: control target
= control target key end

     0   :  { %s2399_s0 = inlined_call_operand.vmem [shape: bf16[256,256], index: 0, kind: input, shape index: {}]   ;;  %s2400_s1 = inlined_call_operand.vmem [shape: f32[256,32], index: 1, kind: input, shape index: {}, may-alias: {1,2}]   ;;  %s2401_s2 = inlined_call_operand.vmem [shape: f32[256,32], index: 2, kind: input, shape index: {}, may-alias: {1,2}]   ;;  %s2402_s3 = inlined_call_operand.vmem [shape: f32[256,1], index: 3, kind: input, shape index: {}]   ;;  %s2403_s4 = inlined_call_operand.vmem [shape: f32[256,32], index: 4, kind: input, shape index: {}, may-alias: {4,6}]   ;;  %s2404_s5 = inlined_call_operand.vmem [shape: f32[256,32], index: 5, kind: output, shape index: {0}]   ;;  %s2405_s6 = inlined_call_operand.vmem [shape: f32[256,32], index: 6, kind: output, shape index: {1}, may-alias: {4,6}]  }
   0x1   :  { %2406 = sst [smem:[#allocation4_spill]] %s2399_s0 }
   0x2   :  { %s1666_s21 = smov 0   ;;  %s1668_s22 = smov 0  }
   0x3   :  { %s1670_s23 = smov 0   ;;  %s1672_s24 = smov 0  }
   0x4   :  { %s1674_s25 = smov 0   ;;  %s1676_s26 = smov 0  }
   0x5   :  { %s1678_s27 = smov 0  }
   0x6 LB: > { %s26_s28 = sadd.s32 1, %s1619_s25  ;;  %s29_s29 = sadd.s32 1, %s1623_s26  ;;  %s1627_s27 = sphi %s1678_s27, %s17_s27   ;;  %s1623_s26 = sphi %s1676_s26, %s2433_s26   ;;  %s1619_s25 = sphi %s1674_s25, %s2432_s25   ;;  %s1615_s24 = sphi %s1672_s24, %s2431_s24   ;;  %s1611_s23 = sphi %s1670_s23, %s2430_s23   ;;  %s1607_s22 = sphi %s1668_s22, %s2429_s22   ;;  %s1603_s21 = sphi %s1666_s21, %s2428_s21  }
   0x7   : > { %p27_p0 = scmp.ge.s32.totalorder %s26_s28, 2  ;;  %p45_p1 = scmp.ne.s32.totalorder %s1607_s22, %s1603_s21 }
   0x8   : > { %p46_p2 = scmp.eq.s32.totalorder %s1627_s27, 0  ;;  %s38_s9 = sadd.s32 1, %s1607_s22 }
   0x9   : > { %s2435_s28 = smov (%p27_p0, %s26_s28), 0  ;;  %s2437_s29 = smov (!%p27_p0, %s29_s29), %s1623_s26 }
   0xa   : > { %p47_p3 = por %p46_p2, %p45_p1  ;;  %p31_p4 = scmp.ge.s32.totalorder %s2437_s29, 2 }
   0xb   : > { %s34_s30 = ssub.s32 %s1619_s25, %s2435_s28  ;;  %p1392_p6 = scmp.ge.s32.totalorder %s1627_s27, 4 }
   0xc   : > { %s2439_s29 = smov (%p31_p4, %s2437_s29), 0 }
   0xd   : > { %s33_s7 = ssub.s32 %s1623_s26, %s2439_s29  ;;  %227 = sbr.rel (%p1392_p6) target bundleno = 44 (0x2c), region = 16 }
   0xe   : > { %s35_s8 = sor.u32 %s34_s30, %s33_s7 }
   0xf   : > { %p36_p5 = scmp.eq.s32.totalorder %s35_s8, 0 }
  0x11   : > { %s1717_s10 = scalar_select %p36_p5, %s1607_s22, %s38_s9  }
  0x12   : > { %230 = sbr.rel (!%p47_p3) target bundleno = 44 (0x2c), region = 20  ;;  %s232_s11 = sand.u32 (%p47_p3), 1, %s1607_s22  }
  0x13   : > { %s1447_s12 = sshll.u32 (%p47_p3), %s1623_s26, 5  ;;  %s1393_s13 = sshll.u32 (%p47_p3), %s232_s11, 6 }
  0x14   : > { %s237_s14 = sadd.s32 (%p47_p3), %s1619_s25, %s1447_s12  ;;  %s2407_s0 = sld [smem:[#allocation4_spill]] (%p47_p3) }
  0x15   : > { %s1396_s15 = sshll.u32 (%p47_p3), %s237_s14, 2  ;;  %s234_s19 = scalar_lea.vmem (%p47_p3), [#allocation3], %s1393_s13 }
  0x1a   : > { %s1726_s18 = scalar_lea.vmem %s2407_s0, %s1396_s15 }
  0x1b   : > { %v256_v0 = vld [vmem:[%s1726_s18] sm:$0xf]  ;;  %v258_v1 = vld [vmem:[%s1726_s18 + $0x8] sm:$0xf]  ;;  %v260_v2 = vld [vmem:[%s1726_s18 + $0x10] sm:$0xf] }
  0x1c   : > { %257 = vst [vmem:[%s234_s19] sm:$0xf] %v256_v0  ;;  %v262_v3 = vld [vmem:[%s1726_s18 + $0x18] sm:$0xf]  ;;  %v264_v4 = vld [vmem:[%s1726_s18 + $0x20] sm:$0xf] }
  0x1d   : > { %259 = vst [vmem:[%s234_s19 + $0x4] sm:$0xf] %v258_v1  ;;  %v266_v5 = vld [vmem:[%s1726_s18 + $0x28] sm:$0xf]  ;;  %v268_v6 = vld [vmem:[%s1726_s18 + $0x30] sm:$0xf] }
  0x1e   : > { %261 = vst [vmem:[%s234_s19 + $0x8] sm:$0xf] %v260_v2  ;;  %v270_v7 = vld [vmem:[%s1726_s18 + $0x38] sm:$0xf]  ;;  %v272_v8 = vld [vmem:[%s1726_s18 + $0x40] sm:$0xf] }
  0x1f   : > { %263 = vst [vmem:[%s234_s19 + $0xc] sm:$0xf] %v262_v3  ;;  %v274_v9 = vld [vmem:[%s1726_s18 + $0x48] sm:$0xf]  ;;  %v276_v10 = vld [vmem:[%s1726_s18 + $0x50] sm:$0xf] }
  0x20   : > { %265 = vst [vmem:[%s234_s19 + $0x10] sm:$0xf] %v264_v4  ;;  %v278_v11 = vld [vmem:[%s1726_s18 + $0x58] sm:$0xf]  ;;  %v280_v12 = vld [vmem:[%s1726_s18 + $0x60] sm:$0xf] }
  0x21   : > { %267 = vst [vmem:[%s234_s19 + $0x14] sm:$0xf] %v266_v5  ;;  %v282_v13 = vld [vmem:[%s1726_s18 + $0x68] sm:$0xf]  ;;  %v284_v14 = vld [vmem:[%s1726_s18 + $0x70] sm:$0xf] }
  0x22   : > { %269 = vst [vmem:[%s234_s19 + $0x18] sm:$0xf] %v268_v6  ;;  %v286_v15 = vld [vmem:[%s1726_s18 + $0x78] sm:$0xf] }
  0x23   : > { %271 = vst [vmem:[%s234_s19 + $0x1c] sm:$0xf] %v270_v7 }
  0x24   : > { %273 = vst [vmem:[%s234_s19 + $0x20] sm:$0xf] %v272_v8 }
  0x25   : > { %275 = vst [vmem:[%s234_s19 + $0x24] sm:$0xf] %v274_v9 }
  0x26   : > { %277 = vst [vmem:[%s234_s19 + $0x28] sm:$0xf] %v276_v10 }
  0x27   : > { %279 = vst [vmem:[%s234_s19 + $0x2c] sm:$0xf] %v278_v11 }
  0x28   : > { %281 = vst [vmem:[%s234_s19 + $0x30] sm:$0xf] %v280_v12 }
  0x29   : > { %283 = vst [vmem:[%s234_s19 + $0x34] sm:$0xf] %v282_v13 }
  0x2a   : > { %285 = vst [vmem:[%s234_s19 + $0x38] sm:$0xf] %v284_v14 }
  0x2b   : > { %287 = vst [vmem:[%s234_s19 + $0x3c] sm:$0xf] %v286_v15 }
  0x2c PF: > { %p1397_p7 = scmp.ge.s32.totalorder %s1627_s27, 1  ;;  %p378_p8 = scmp.lt.s32.totalorder %s1627_s27, 5 }
  0x2e   : > { %p379_p9 = pnand %p1397_p7, %p378_p8 }
  0x2f   : > { %s385_s20 = sand.u32 (!%p379_p9), 1, %s1603_s21   ;;  %s1399_s30 = sshll.u32 (!%p379_p9), %s1611_s23, 4 }
  0x30   : > { %382 = sbr.rel (%p379_p9) target bundleno = 625 (0x271), region = 77  ;;  %s1398_s7 = sshll.u32 (!%p379_p9), %s385_s20, 6 }
  0x31   : > { %p441_p10 = scmp.lt.s32.totalorder (!%p379_p9), %s1399_s30, 31  ;;  %s1401_s8 = sshll.u32 (!%p379_p9), %s1615_s24, 4 }
  0x32   : > { %p447_p11 = scmp.lt.s32.totalorder (!%p379_p9), %s1401_s8, 31  ;;  %s1779_s16 = scalar_lea.vmem (!%p379_p9), [#allocation3], %s1398_s7 }
  0x33   : > { %p1411_p12 = scmp.ne.s32.totalorder (!%p379_p9), %s1611_s23, 0 }
  0x35   : > { %s2441_s30 = smov (!%p441_p10, %s1399_s30), 31  ;;  %s2443_s8 = smov (!%p447_p11, %s1401_s8), 31 }
  0x36   : > { %s1400_s9 = sshll.u32 %s2441_s30, 3  ;;  %s1402_s14 = sshll.u32 %s2443_s8, 3 }
  0x37   : > { %s1752_s13 = scalar_lea.vmem %s2400_s1, %s1400_s9  ;;  %s1757_s17 = scalar_lea.vmem %s2401_s2, %s1402_s14 }
  0x38   : > { %s1762_s19 = scalar_lea.vmem %s2402_s3, %s1402_s14  ;;  %s1767_s30 = scalar_lea.vmem %s2403_s4, %s1402_s14 }
  0x39   : > { %s1772_s12 = scalar_lea.vmem %s2404_s5, %s1402_s14  ;;  %s1777_s15 = scalar_lea.vmem %s2405_s6, %s1402_s14 }
  0x3a   : > { %479 = sbr.rel (%p1411_p12) target bundleno = 80 (0x50), region = 85 }
  0x3f   : > { %vm480_vm0 = vcmask 261120   ;;  %v1629_v16 = vmov 0.0  }
  0x40   : > { %481 = vst.msk [vmem:[#allocation2] sm:$0xff] %vm480_vm0, %v1629_v16 }
  0x41   : > { %482 = vst.msk [vmem:[#allocation2 + $0x8] sm:$0xff] %vm480_vm0, %v1629_v16 }
  0x42   : > { %483 = vst.msk [vmem:[#allocation2 + $0x10] sm:$0xff] %vm480_vm0, %v1629_v16 }
  0x43   : > { %484 = vst.msk [vmem:[#allocation2 + $0x18] sm:$0xff] %vm480_vm0, %v1629_v16 }
  0x44   : > { %485 = vst.msk [vmem:[#allocation2 + $0x20] sm:$0xff] %vm480_vm0, %v1629_v16 }
  0x45   : > { %486 = vst.msk [vmem:[#allocation2 + $0x28] sm:$0xff] %vm480_vm0, %v1629_v16 }
  0x46   : > { %487 = vst.msk [vmem:[#allocation2 + $0x30] sm:$0xff] %vm480_vm0, %v1629_v16 }
  0x47   : > { %488 = vst.msk [vmem:[#allocation2 + $0x38] sm:$0xff] %vm480_vm0, %v1629_v16 }
  0x48   : > { %489 = vst.msk [vmem:[#allocation2 + $0x40] sm:$0xff] %vm480_vm0, %v1629_v16 }
  0x49   : > { %490 = vst.msk [vmem:[#allocation2 + $0x48] sm:$0xff] %vm480_vm0, %v1629_v16 }
  0x4a   : > { %491 = vst.msk [vmem:[#allocation2 + $0x50] sm:$0xff] %vm480_vm0, %v1629_v16 }
  0x4b   : > { %492 = vst.msk [vmem:[#allocation2 + $0x58] sm:$0xff] %vm480_vm0, %v1629_v16 }
  0x4c   : > { %493 = vst.msk [vmem:[#allocation2 + $0x60] sm:$0xff] %vm480_vm0, %v1629_v16 }
  0x4d   : > { %494 = vst.msk [vmem:[#allocation2 + $0x68] sm:$0xff] %vm480_vm0, %v1629_v16 }
  0x4e   : > { %495 = vst.msk [vmem:[#allocation2 + $0x70] sm:$0xff] %vm480_vm0, %v1629_v16 }
  0x4f   : > { %496 = vst.msk [vmem:[#allocation2 + $0x78] sm:$0xff] %vm480_vm0, %v1629_v16 }
  0x50 PF: > { %v543_v17 = vld [vmem:[%s1752_s13 + $0x70] sm:$0xff]  ;;  %v544_v18 = vld [vmem:[%s1752_s13 + $0x78] sm:$0xff]  ;;  %v541_v19 = vld [vmem:[%s1752_s13 + $0x60] sm:$0xff]  ;;  %vm666_vm1 = vcmask 261120   ;;  %p1444_p13 = scmp.ne.s32.totalorder %s1611_s23, 1 }
  0x51   : > { %v552_v20 = vpack.c.bf16 %v544_v18, %v543_v17  ;;  %v542_v21 = vld [vmem:[%s1752_s13 + $0x68] sm:$0xff]  ;;  %v539_v23 = vld [vmem:[%s1752_s13 + $0x50] sm:$0xff]  ;;  %v540_v24 = vld [vmem:[%s1752_s13 + $0x58] sm:$0xff] }
  0x52   : > { %v551_v22 = vpack.c.bf16 %v542_v21, %v541_v19  ;;  %v550_v25 = vpack.c.bf16 %v540_v24, %v539_v23  ;;  %v537_v26 = vld [vmem:[%s1752_s13 + $0x40] sm:$0xff]  ;;  %v538_v27 = vld [vmem:[%s1752_s13 + $0x48] sm:$0xff]  ;;  %v535_v29 = vld [vmem:[%s1752_s13 + $0x30] sm:$0xff] }
  0x53   : > { %601 = vmatpush.bf16.msra.mxu0 %v552_v20  ;;  %1456 = vmatpush.bf16.msra.mxu1 %v552_v20  ;;  %v549_v28 = vpack.c.bf16 %v538_v27, %v537_v26  ;;  %v536_v30 = vld [vmem:[%s1752_s13 + $0x38] sm:$0xff]  ;;  %v533_v32 = vld [vmem:[%s1752_s13 + $0x20] sm:$0xff]  ;;  %v534_v33 = vld [vmem:[%s1752_s13 + $0x28] sm:$0xff] }
  0x54   : > { %1457 = vmatpush.bf16.msra.mxu2 %v552_v20  ;;  %1458 = vmatpush.bf16.msra.mxu3 %v552_v20  ;;  %v548_v31 = vpack.c.bf16 %v536_v30, %v535_v29  ;;  %v547_v34 = vpack.c.bf16 %v534_v33, %v533_v32  ;;  %v531_v35 = vld [vmem:[%s1752_s13 + $0x10] sm:$0xff]  ;;  %v532_v36 = vld [vmem:[%s1752_s13 + $0x18] sm:$0xff]  ;;  %v529_v38 = vld [vmem:[%s1752_s13] sm:$0xff] }
  0x55   : > { %v546_v37 = vpack.c.bf16 %v532_v36, %v531_v35  ;;  %v530_v39 = vld [vmem:[%s1752_s13 + $0x8] sm:$0xff]  ;;  %v1448_v41 = vld [vmem:[%s1779_s16] sm:$0xff]  ;;  %v1450_v42 = vld [vmem:[%s1779_s16 + $0x10] sm:$0xff] }
  0x56   : > { %v545_v40 = vpack.c.bf16 %v530_v39, %v529_v38  ;;  %v1452_v43 = vld [vmem:[%s1779_s16 + $0x20] sm:$0xff]  ;;  %v1454_v44 = vld [vmem:[%s1779_s16 + $0x30] sm:$0xff]  ;;  %v1449_v45 = vld [vmem:[%s1779_s16 + $0x8] sm:$0xff] }
  0x57   : > { %602 = vmatpush.bf16.msra.mxu0 %v551_v22  ;;  %1459 = vmatpush.bf16.msra.mxu1 %v551_v22  ;;  %v1451_v46 = vld [vmem:[%s1779_s16 + $0x18] sm:$0xff]  ;;  %v1453_v47 = vld [vmem:[%s1779_s16 + $0x28] sm:$0xff]  ;;  %v497_v49 = vld [vmem:[#allocation2] sm:$0xff] }
  0x58   : > { %1460 = vmatpush.bf16.msra.mxu2 %v551_v22  ;;  %1461 = vmatpush.bf16.msra.mxu3 %v551_v22  ;;  %v1455_v48 = vld [vmem:[%s1779_s16 + $0x38] sm:$0xff]  ;;  %v501_v50 = vld [vmem:[#allocation2 + $0x20] sm:$0xff]  ;;  %v498_v57 = vld [vmem:[#allocation2 + $0x8] sm:$0xff] }
  0x59   : > { %v505_v55 = vld [vmem:[#allocation2 + $0x40] sm:$0xff]  ;;  %v502_v58 = vld [vmem:[#allocation2 + $0x28] sm:$0xff]  ;;  %v499_v5 = vld [vmem:[#allocation2 + $0x10] sm:$0xff] }
  0x5a   : > { %v509_v56 = vld [vmem:[#allocation2 + $0x60] sm:$0xff]  ;;  %v506_v3 = vld [vmem:[#allocation2 + $0x48] sm:$0xff]  ;;  %v503_v6 = vld [vmem:[#allocation2 + $0x30] sm:$0xff] }
  0x5b   : > { %603 = vmatpush.bf16.msra.mxu0 %v550_v25  ;;  %1462 = vmatpush.bf16.msra.mxu1 %v550_v25  ;;  %v510_v4 = vld [vmem:[#allocation2 + $0x68] sm:$0xff]  ;;  %v507_v15 = vld [vmem:[#allocation2 + $0x50] sm:$0xff]  ;;  %v500_v17 = vld [vmem:[#allocation2 + $0x18] sm:$0xff] }
  0x5c   : > { %1463 = vmatpush.bf16.msra.mxu2 %v550_v25  ;;  %1464 = vmatpush.bf16.msra.mxu3 %v550_v25  ;;  %v511_v16 = vld [vmem:[#allocation2 + $0x70] sm:$0xff]  ;;  %v504_v18 = vld [vmem:[#allocation2 + $0x38] sm:$0xff] }
  0x5d   : > { %v508_v27 = vld [vmem:[#allocation2 + $0x58] sm:$0xff] }
  0x5f   : > { %604 = vmatpush.bf16.msra.mxu0 %v549_v28  ;;  %1465 = vmatpush.bf16.msra.mxu1 %v549_v28 }
  0x60   : > { %1466 = vmatpush.bf16.msra.mxu2 %v549_v28  ;;  %1467 = vmatpush.bf16.msra.mxu3 %v549_v28  ;;  %v512_v28 = vld [vmem:[#allocation2 + $0x78] sm:$0xff] }
  0x63   : > { %605 = vmatpush.bf16.msra.mxu0 %v548_v31  ;;  %1468 = vmatpush.bf16.msra.mxu1 %v548_v31 }
  0x64   : > { %1469 = vmatpush.bf16.msra.mxu2 %v548_v31  ;;  %1470 = vmatpush.bf16.msra.mxu3 %v548_v31 }
  0x67   : > { %606 = vmatpush.bf16.msra.mxu0 %v547_v34  ;;  %1471 = vmatpush.bf16.msra.mxu1 %v547_v34 }
  0x68   : > { %1472 = vmatpush.bf16.msra.mxu2 %v547_v34  ;;  %1473 = vmatpush.bf16.msra.mxu3 %v547_v34 }
  0x6b   : > { %607 = vmatpush.bf16.msra.mxu0 %v546_v37  ;;  %1474 = vmatpush.bf16.msra.mxu1 %v546_v37 }
  0x6c   : > { %1475 = vmatpush.bf16.msra.mxu2 %v546_v37  ;;  %1476 = vmatpush.bf16.msra.mxu3 %v546_v37 }
  0x6f   : > { %608 = vmatpush.bf16.msra.mxu0 %v545_v40  ;;  %1477 = vmatpush.bf16.msra.mxu1 %v545_v40 }
  0x70   : > { %1478 = vmatpush.bf16.msra.mxu2 %v545_v40  ;;  %1479 = vmatpush.bf16.msra.mxu3 %v545_v40 }
  0x72   : > { %609 = vmatmul.bf16.vlgmr.msra.gmra.mxu0 %v1448_v41  ;;  %619 = vmatmul.bf16.vlgmr.msra.gmra.mxu1 %v1450_v42 }
  0x73   : > { %629 = vmatmul.bf16.vlgmr.msra.gmra.mxu2 %v1452_v43  ;;  %639 = vmatmul.bf16.vlgmr.msra.gmra.mxu3 %v1454_v44 }
  0x82   : > { %614 = vmatmul.bf16.gmra.mxu0 %v1449_v45  ;;  %624 = vmatmul.bf16.gmra.mxu1 %v1451_v46 }
  0x83   : > { %634 = vmatmul.bf16.gmra.mxu2 %v1453_v47  ;;  %644 = vmatmul.bf16.gmra.mxu3 %v1455_v48 }
  0xef   : > { %v610_v51 = vpop.f32.mrf.mxu0  ;;  %v620_v52 = vpop.f32.mrf.mxu1 }
  0xf0   : > { %v650_v53 = vadd.f32 %v610_v51, %v497_v49  ;;  %v654_v54 = vadd.f32 %v620_v52, %v501_v50 }
  0xf2   : > { %667 = vst.msk [vmem:[#allocation2] sm:$0xff] %vm666_vm1, %v650_v53 }
  0xf3   : > { %671 = vst.msk [vmem:[#allocation2 + $0x20] sm:$0xff] %vm666_vm1, %v654_v54 }
  0xf6   : > { %v630_v59 = vpop.f32.mrf.mxu2  ;;  %v640_v60 = vpop.f32.mrf.mxu3 }
  0xf7   : > { %v658_v61 = vadd.f32 %v630_v59, %v505_v55  ;;  %v662_v62 = vadd.f32 %v640_v60, %v509_v56  ;;  %v612_v63 = vpop.f32.mrf.mxu0  ;;  %v622_v0 = vpop.f32.mrf.mxu1 }
  0xf8   : > { %v651_v1 = vadd.f32 %v612_v63, %v498_v57  ;;  %v655_v2 = vadd.f32 %v622_v0, %v502_v58 }
  0xf9   : > { %675 = vst.msk [vmem:[#allocation2 + $0x40] sm:$0xff] %vm666_vm1, %v658_v61 }
  0xfa   : > { %679 = vst.msk [vmem:[#allocation2 + $0x60] sm:$0xff] %vm666_vm1, %v662_v62 }
  0xfb   : > { %668 = vst.msk [vmem:[#allocation2 + $0x8] sm:$0xff] %vm666_vm1, %v651_v1 }
  0xfc   : > { %672 = vst.msk [vmem:[#allocation2 + $0x28] sm:$0xff] %vm666_vm1, %v655_v2 }
  0xfe   : > { %v632_v7 = vpop.f32.mrf.mxu2  ;;  %v642_v8 = vpop.f32.mrf.mxu3 }
  0xff   : > { %v659_v9 = vadd.f32 %v632_v7, %v506_v3  ;;  %v663_v10 = vadd.f32 %v642_v8, %v510_v4  ;;  %v615_v11 = vpop.f32.mrf.mxu0  ;;  %v625_v12 = vpop.f32.mrf.mxu1 }
 0x100   : > { %v652_v13 = vadd.f32 %v615_v11, %v499_v5  ;;  %v656_v14 = vadd.f32 %v625_v12, %v503_v6 }
 0x101   : > { %676 = vst.msk [vmem:[#allocation2 + $0x48] sm:$0xff] %vm666_vm1, %v659_v9 }
 0x102   : > { %680 = vst.msk [vmem:[#allocation2 + $0x68] sm:$0xff] %vm666_vm1, %v663_v10 }
 0x103   : > { %669 = vst.msk [vmem:[#allocation2 + $0x10] sm:$0xff] %vm666_vm1, %v652_v13 }
 0x104   : > { %673 = vst.msk [vmem:[#allocation2 + $0x30] sm:$0xff] %vm666_vm1, %v656_v14 }
 0x106   : > { %v635_v19 = vpop.f32.mrf.mxu2  ;;  %v645_v20 = vpop.f32.mrf.mxu3 }
 0x107   : > { %v660_v21 = vadd.f32 %v635_v19, %v507_v15  ;;  %v664_v22 = vadd.f32 %v645_v20, %v511_v16  ;;  %v617_v23 = vpop.f32.mrf.mxu0  ;;  %v627_v24 = vpop.f32.mrf.mxu1 }
 0x108   : > { %v653_v25 = vadd.f32 %v617_v23, %v500_v17  ;;  %v657_v26 = vadd.f32 %v627_v24, %v504_v18 }
 0x109   : > { %677 = vst.msk [vmem:[#allocation2 + $0x50] sm:$0xff] %vm666_vm1, %v660_v21 }
 0x10a   : > { %681 = vst.msk [vmem:[#allocation2 + $0x70] sm:$0xff] %vm666_vm1, %v664_v22 }
 0x10b   : > { %670 = vst.msk [vmem:[#allocation2 + $0x18] sm:$0xff] %vm666_vm1, %v653_v25 }
 0x10c   : > { %674 = vst.msk [vmem:[#allocation2 + $0x38] sm:$0xff] %vm666_vm1, %v657_v26 }
 0x10e   : > { %v637_v29 = vpop.f32.mrf.mxu2  ;;  %v647_v30 = vpop.f32.mrf.mxu3  ;;  %686 = sbr.rel (%p1444_p13) target bundleno = 625 (0x271), region = 89 }
 0x10f   : > { %v661_v31 = vadd.f32 %v637_v29, %v508_v27  ;;  %v665_v32 = vadd.f32 %v647_v30, %v512_v28 }
 0x111   : > { %678 = vst.msk [vmem:[#allocation2 + $0x58] sm:$0xff] %vm666_vm1, %v661_v31 }
 0x112   : > { %682 = vst.msk [vmem:[#allocation2 + $0x78] sm:$0xff] %vm666_vm1, %v665_v32 }
 0x113   : > { %v1839_v33 = vld [vmem:[#allocation2 + $0x20] sm:$0xff]  ;;  %v1842_v35 = vld [vmem:[#allocation2 + $0x10] sm:$0xff]  ;;  %v1851_v42 = vld [vmem:[#allocation2 + $0x28] sm:$0xff] }
 0x114   : > { %v707_v34 = vld [vmem:[%s1757_s17 + $0x20] sm:$0xff]  ;;  %v705_v37 = vld [vmem:[%s1757_s17 + $0x10] sm:$0xff]  ;;  %v708_v43 = vld [vmem:[%s1757_s17 + $0x28] sm:$0xff] }
 0x115   : > { %v723_v36 = vmul.f32 %v707_v34, %v1839_v33  ;;  %v1846_v38 = vld [vmem:[#allocation2] sm:$0xff]  ;;  %v721_v40 = vmul.f32 %v705_v37, %v1842_v35  ;;  %v1854_v44 = vld [vmem:[#allocation2 + $0x18] sm:$0xff]  ;;  %v1858_v47 = vld [vmem:[#allocation2 + $0x8] sm:$0xff]  ;;  %v724_v51 = vmul.f32 %v708_v43, %v1851_v42  ;;  %v785_v43 = vmul.f32 %v1842_v35, %v1842_v35 }
 0x116   : > { %v703_v39 = vld [vmem:[%s1757_s17] sm:$0xff]  ;;  %v706_v46 = vld [vmem:[%s1757_s17 + $0x18] sm:$0xff]  ;;  %v704_v48 = vld [vmem:[%s1757_s17 + $0x8] sm:$0xff]  ;;  %v784_v31 = vmul.f32 %v1858_v47, %v1858_v47  ;;  %v783_v32 = vmul.f32 %v1846_v38, %v1846_v38 }
 0x117   : > { %v719_v41 = vmul.f32 %v703_v39, %v1846_v38  ;;  %v747_v45 = vsel %vm666_vm1, %v723_v36, 0.0  ;;  %v741_v49 = vsel %vm666_vm1, %v721_v40, 0.0  ;;  %v722_v52 = vmul.f32 %v706_v46, %v1854_v44  ;;  %v1869_v57 = vld [vmem:[#allocation2 + $0x40] sm:$0xff]  ;;  %v1872_v59 = vld [vmem:[#allocation2 + $0x38] sm:$0xff]  ;;  %v1875_v61 = vld [vmem:[#allocation2 + $0x30] sm:$0xff] }
 0x118   : > { %748 = vadd.xlane.f32.xlu2 %v747_v45  ;;  %742 = vadd.xlane.f32.xlu1 %v741_v49  ;;  %v720_v53 = vmul.f32 %v704_v48, %v1858_v47  ;;  %v750_v54 = vsel %vm666_vm1, %v724_v51, 0.0  ;;  %v711_v58 = vld [vmem:[%s1757_s17 + $0x40] sm:$0xff]  ;;  %v710_v60 = vld [vmem:[%s1757_s17 + $0x38] sm:$0xff]  ;;  %v709_v62 = vld [vmem:[%s1757_s17 + $0x30] sm:$0xff]  ;;  %v802_v36 = vsel %vm666_vm1, %v784_v31, 0.0  ;;  %v799_v37 = vsel %vm666_vm1, %v783_v32, 0.0 }
 0x119   : > { %v735_v50 = vsel %vm666_vm1, %v719_v41, 0.0  ;;  %v744_v55 = vsel %vm666_vm1, %v722_v52, 0.0  ;;  %v727_v63 = vmul.f32 %v711_v58, %v1869_v57  ;;  %v726_v0 = vmul.f32 %v710_v60, %v1872_v59  ;;  %v1884_v5 = vld [vmem:[#allocation2 + $0x58] sm:$0xff]  ;;  %v1887_v7 = vld [vmem:[#allocation2 + $0x50] sm:$0xff]  ;;  %v1890_v9 = vld [vmem:[#allocation2 + $0x48] sm:$0xff] }
 0x11a   : > { %736 = vadd.xlane.f32.xlu0 %v735_v50  ;;  %v738_v56 = vsel %vm666_vm1, %v720_v53, 0.0  ;;  %v725_v1 = vmul.f32 %v709_v62, %v1875_v61  ;;  %v714_v6 = vld [vmem:[%s1757_s17 + $0x58] sm:$0xff]  ;;  %v713_v8 = vld [vmem:[%s1757_s17 + $0x50] sm:$0xff]  ;;  %v712_v10 = vld [vmem:[%s1757_s17 + $0x48] sm:$0xff]  ;;  %v787_v40 = vmul.f32 %v1839_v33, %v1839_v33  ;;  %v786_v41 = vmul.f32 %v1854_v44, %v1854_v44 }
 0x11b   : > { %v759_v2 = vsel %vm666_vm1, %v727_v63, 0.0  ;;  %v756_v3 = vsel %vm666_vm1, %v726_v0, 0.0  ;;  %v730_v11 = vmul.f32 %v714_v6, %v1884_v5  ;;  %v729_v12 = vmul.f32 %v713_v8, %v1887_v7  ;;  %v1899_v17 = vld [vmem:[#allocation2 + $0x70] sm:$0xff]  ;;  %v1902_v19 = vld [vmem:[#allocation2 + $0x68] sm:$0xff]  ;;  %v1905_v21 = vld [vmem:[#allocation2 + $0x60] sm:$0xff] }
 0x11c   : > { %v753_v4 = vsel %vm666_vm1, %v725_v1, 0.0  ;;  %v728_v13 = vmul.f32 %v712_v10, %v1890_v9  ;;  %v717_v18 = vld [vmem:[%s1757_s17 + $0x70] sm:$0xff]  ;;  %v716_v20 = vld [vmem:[%s1757_s17 + $0x68] sm:$0xff]  ;;  %v715_v22 = vld [vmem:[%s1757_s17 + $0x60] sm:$0xff]  ;;  %v811_v45 = vsel %vm666_vm1, %v787_v40, 0.0  ;;  %v808_v46 = vsel %vm666_vm1, %v786_v41, 0.0 }
 0x11d   : > { %v768_v14 = vsel %vm666_vm1, %v730_v11, 0.0  ;;  %v765_v15 = vsel %vm666_vm1, %v729_v12, 0.0  ;;  %v733_v23 = vmul.f32 %v717_v18, %v1899_v17  ;;  %v732_v24 = vmul.f32 %v716_v20, %v1902_v19  ;;  %v1914_v29 = vld [vmem:[#allocation2 + $0x78] sm:$0xff] }
 0x11e   : > { %v762_v16 = vsel %vm666_vm1, %v728_v13, 0.0  ;;  %v731_v25 = vmul.f32 %v715_v22, %v1905_v21  ;;  %v718_v30 = vld [vmem:[%s1757_s17 + $0x78] sm:$0xff]  ;;  %v805_v48 = vsel %vm666_vm1, %v785_v43, 0.0  ;;  %v790_v49 = vmul.f32 %v1872_v59, %v1872_v59 }
 0x11f   : > { %v777_v26 = vsel %vm666_vm1, %v733_v23, 0.0  ;;  %v774_v27 = vsel %vm666_vm1, %v732_v24, 0.0  ;;  %v734_v34 = vmul.f32 %v718_v30, %v1914_v29  ;;  %v789_v50 = vmul.f32 %v1875_v61, %v1875_v61 }
 0x120   : > { %751 = vadd.xlane.f32.xlu2 %v750_v54  ;;  %745 = vadd.xlane.f32.xlu1 %v744_v55  ;;  %v771_v28 = vsel %vm666_vm1, %v731_v25, 0.0  ;;  %v788_v51 = vmul.f32 %v1851_v42, %v1851_v42  ;;  %v820_v52 = vsel %vm666_vm1, %v790_v49, 0.0  ;;  %v793_v55 = vmul.f32 %v1887_v7, %v1887_v7 }
 0x121   : > { %v780_v39 = vsel %vm666_vm1, %v734_v34, 0.0  ;;  %v817_v53 = vsel %vm666_vm1, %v789_v50, 0.0  ;;  %v791_v58 = vmul.f32 %v1869_v57, %v1869_v57  ;;  %v796_v0 = vmul.f32 %v1902_v19, %v1902_v19 }
 0x122   : > { %739 = vadd.xlane.f32.xlu0 %v738_v56  ;;  %v814_v54 = vsel %vm666_vm1, %v788_v51, 0.0  ;;  %v792_v56 = vmul.f32 %v1890_v9, %v1890_v9  ;;  %v829_v60 = vsel %vm666_vm1, %v793_v55, 0.0  ;;  %v795_v1 = vmul.f32 %v1905_v21, %v1905_v21 }
 0x123   : > { %v823_v63 = vsel %vm666_vm1, %v791_v58, 0.0  ;;  %v798_v8 = vmul.f32 %v1914_v29, %v1914_v29  ;;  %v797_v10 = vmul.f32 %v1899_v17, %v1899_v17  ;;  %v1630_v32 = vmov 0  }
 0x124   : > { %v826_v62 = vsel %vm666_vm1, %v792_v56, 0.0  ;;  %1539 = vset.pattern.permute.xlu0 %v1630_v32  ;;  %1538 = vset.pattern.permute.xlu2 %v1630_v32 }
 0x125   : > { %v844_v11 = vsel %vm666_vm1, %v798_v8, 0.0  ;;  %v841_v12 = vsel %vm666_vm1, %v797_v10, 0.0  ;;  %1540 = vset.pattern.permute.xlu1 %v1630_v32 }
 0x128   : > { %760 = vadd.xlane.f32.xlu2 %v759_v2  ;;  %757 = vadd.xlane.f32.xlu1 %v756_v3  ;;  %v794_v2 = vmul.f32 %v1884_v5, %v1884_v5  ;;  %v838_v3 = vsel %vm666_vm1, %v796_v0, 0.0 }
 0x12a   : > { %754 = vadd.xlane.f32.xlu0 %v753_v4  ;;  %v835_v4 = vsel %vm666_vm1, %v795_v1, 0.0  ;;  %v832_v6 = vsel %vm666_vm1, %v794_v2, 0.0 }
 0x130   : > { %769 = vadd.xlane.f32.xlu2 %v768_v14  ;;  %766 = vadd.xlane.f32.xlu1 %v765_v15 }
 0x132   : > { %763 = vadd.xlane.f32.xlu0 %v762_v16 }
 0x138   : > { %778 = vadd.xlane.f32.xlu2 %v777_v26  ;;  %775 = vadd.xlane.f32.xlu1 %v774_v27 }
 0x13a   : > { %772 = vadd.xlane.f32.xlu0 %v771_v28 }
 0x140   : > { %803 = vadd.xlane.f32.xlu2 %v802_v36  ;;  %800 = vadd.xlane.f32.xlu1 %v799_v37 }
 0x142   : > { %781 = vadd.xlane.f32.xlu0 %v780_v39 }
 0x148   : > { %812 = vadd.xlane.f32.xlu2 %v811_v45  ;;  %809 = vadd.xlane.f32.xlu1 %v808_v46 }
 0x14a   : > { %806 = vadd.xlane.f32.xlu0 %v805_v48 }
 0x150   : > { %821 = vadd.xlane.f32.xlu2 %v820_v52  ;;  %818 = vadd.xlane.f32.xlu1 %v817_v53 }
 0x152   : > { %815 = vadd.xlane.f32.xlu0 %v814_v54 }
 0x158   : > { %830 = vadd.xlane.f32.xlu2 %v829_v60  ;;  %827 = vadd.xlane.f32.xlu1 %v826_v62 }
 0x15a   : > { %824 = vadd.xlane.f32.xlu0 %v823_v63 }
 0x160   : > { %839 = vadd.xlane.f32.xlu2 %v838_v3  ;;  %836 = vadd.xlane.f32.xlu1 %v835_v4 }
 0x162   : > { %833 = vadd.xlane.f32.xlu0 %v832_v6 }
 0x168   : > { %845 = vadd.xlane.f32.xlu1 %v844_v11 }
 0x16a   : > { %842 = vadd.xlane.f32.xlu0 %v841_v12 }
 0x18b   : > { %v1967_v13 = vpop.xlane.xlu2 %748  ;;  %v1969_v14 = vpop.xlane.xlu1 %742 }
 0x18d   : > { %v1971_v15 = vpop.xlane.xlu0 %736 }
 0x193   : > { %v1973_v16 = vpop.xlane.xlu2 %751  ;;  %v1975_v18 = vpop.xlane.xlu1 %745 }
 0x195   : > { %v1977_v20 = vpop.xlane.xlu0 %739 }
 0x19b   : > { %v1979_v22 = vpop.xlane.xlu2 %760  ;;  %v1981_v23 = vpop.xlane.xlu1 %757 }
 0x19d   : > { %v1983_v24 = vpop.xlane.xlu0 %754 }
 0x1a3   : > { %v1985_v25 = vpop.xlane.xlu2 %769  ;;  %v1987_v26 = vpop.xlane.xlu1 %766 }
 0x1a5   : > { %v1989_v27 = vpop.xlane.xlu0 %763 }
 0x1ab   : > { %v1991_v28 = vpop.xlane.xlu2 %778  ;;  %v1993_v30 = vpop.xlane.xlu1 %775 }
 0x1ad   : > { %v1995_v31 = vpop.xlane.xlu0 %772 }
 0x1b3   : > { %v804_v34 = vpop.xlane.xlu2 %803  ;;  %v801_v36 = vpop.xlane.xlu1 %800 }
 0x1b4   : > { %1541 = vrsqrt.f32 %v804_v34  ;;  %vm853_vm2 = vweird.f32 %v801_v36  ;;  %vm863_vm4 = vweird.f32 %v804_v34 }
 0x1b5   : > { %v1997_v37 = vpop.xlane.xlu0 %781  ;;  %1543 = vrsqrt.f32 %v801_v36 }
 0x1ba   : > { %v1542_v39 = vpop.eup %1541 }
 0x1bb   : > { %v1544_v40 = vpop.eup %1543  ;;  %v858_v41 = vmul.f32 %v1542_v39, %v804_v34  ;;  %v1999_v43 = vpop.xlane.xlu2 %812  ;;  %vm864_vm5 = vweird.f32 %v1542_v39 }
 0x1bc   : > { %v848_v45 = vmul.f32 %v1544_v40, %v801_v36  ;;  %1545 = vrsqrt.f32 %v1999_v43  ;;  %v810_v46 = vpop.xlane.xlu1 %809  ;;  %vm854_vm3 = vweird.f32 %v1544_v40  ;;  %vm2024_vm7 = vmor %vm863_vm4, %vm864_vm5  ;;  %vm893_vm14 = vweird.f32 %v1999_v43 }
 0x1bd   : > { %v2002_v48 = vpop.xlane.xlu0 %806  ;;  %v859_v49 = vmul.f32 %v1542_v39, %v858_v41  ;;  %1547 = vrsqrt.f32 %v810_v46  ;;  %vm855_vm6 = vmor %vm853_vm2, %vm854_vm3  ;;  %vm883_vm8 = vweird.f32 %v810_v46 }
 0x1be   : > { %v849_v50 = vmul.f32 %v1544_v40, %v848_v45  ;;  %1549 = vrsqrt.f32 %v2002_v48  ;;  %vm873_vm12 = vweird.f32 %v2002_v48 }
 0x1bf   : > { %v860_v51 = vmul.f32 0.5, %v859_v49  ;;  %v1039_v49 = vld [vmem:[%s1762_s19] sm:$0xff] }
 0x1c0   : > { %v850_v52 = vmul.f32 0.5, %v849_v50 }
 0x1c1   : > { %v861_v53 = vsub.f32 1.5, %v860_v51 }
 0x1c2   : > { %v2005_v54 = vpop.eup %1545  ;;  %v851_v55 = vsub.f32 1.5, %v850_v52 }
 0x1c3   : > { %v2007_v56 = vpop.eup %1547  ;;  %v862_v58 = vmul.f32 %v1542_v39, %v861_v53  ;;  %v888_v60 = vmul.f32 %v2005_v54, %v1999_v43  ;;  %v2011_v62 = vpop.xlane.xlu2 %821  ;;  %vm894_vm15 = vweird.f32 %v2005_v54 }
 0x1c4   : > { %v2013_v63 = vpop.eup %1549  ;;  %v852_v0 = vmul.f32 %v1544_v40, %v851_v55  ;;  %v878_v1 = vmul.f32 %v2007_v56, %v810_v46  ;;  %1551 = vrsqrt.f32 %v2011_v62  ;;  %v2017_v2 = vpop.xlane.xlu1 %818  ;;  %vm884_vm9 = vweird.f32 %v2007_v56  ;;  %vm2093_vm2 = vmor %vm893_vm14, %vm894_vm15 }
 0x1c5   : > { %v2019_v3 = vpop.xlane.xlu0 %815  ;;  %v889_v4 = vmul.f32 %v2005_v54, %v888_v60  ;;  %v868_v6 = vmul.f32 %v2013_v63, %v2002_v48  ;;  %v866_v12 = vsel %vm2024_vm7, %v1542_v39, %v862_v58  ;;  %1553 = vrsqrt.f32 %v2017_v2  ;;  %vm2044_vm10 = vmor %vm883_vm8, %vm884_vm9 }
 0x1c6   : > { %v856_v10 = vsel %vm855_vm6, %v1544_v40, %v852_v0  ;;  %v879_v11 = vmul.f32 %v2007_v56, %v878_v1  ;;  %1555 = vrsqrt.f32 %v2019_v3  ;;  %v1008_v51 = vmin.f32 %v866_v12, 1e+08 }
 0x1c7   : > { %v1007_v32 = vmin.f32 %v856_v10, 1e+08  ;;  %v869_v34 = vmul.f32 %v2013_v63, %v868_v6  ;;  %v890_v41 = vmul.f32 0.5, %v889_v4  ;;  %vm874_vm11 = vweird.f32 %v2013_v63 }
 0x1c8   : > { %v880_v36 = vmul.f32 0.5, %v879_v11  ;;  %v1024_v11 = vmul.f32 %v1008_v51, %v1977_v20  ;;  %vm2067_vm13 = vmor %vm873_vm12, %vm874_vm11  ;;  %vm913_vm0 = vweird.f32 %v2017_v2  ;;  %vm903_vm3 = vweird.f32 %v2019_v3 }
 0x1c9   : > { %v870_v45 = vmul.f32 0.5, %v869_v34  ;;  %v1023_v40 = vmul.f32 %v1007_v32, %v1971_v15  ;;  %v891_v4 = vsub.f32 1.5, %v890_v41  ;;  %vm923_vm6 = vweird.f32 %v2011_v62 }
 0x1ca   : > { %v2037_v50 = vpop.eup %1551  ;;  %v881_v39 = vsub.f32 1.5, %v880_v36  ;;  %v1040_v36 = vld [vmem:[%s1762_s19 + $0x8] sm:$0xff] }
 0x1cb   : > { %v871_v52 = vsub.f32 1.5, %v870_v45  ;;  %v918_v53 = vmul.f32 %v2037_v50, %v2011_v62  ;;  %v2041_v55 = vpop.xlane.xlu2 %830  ;;  %v1055_v0 = vmul.f32 %v1039_v49, %v1023_v40  ;;  %v2054_v1 = vpop.eup %1553  ;;  %vm924_vm8 = vweird.f32 %v2037_v50 }
 0x1cc   : > { %v882_v46 = vmul.f32 %v2007_v56, %v881_v39  ;;  %1557 = vrsqrt.f32 %v2041_v55  ;;  %v2050_v15 = vpop.xlane.xlu1 %827  ;;  %v1556_v8 = vpop.eup %1555  ;;  %v908_v10 = vmul.f32 %v2054_v1, %v2017_v2  ;;  %v1056_v39 = vmul.f32 %v1040_v36, %v1024_v11  ;;  %vm2159_vm14 = vmor %vm923_vm6, %vm924_vm8 }
 0x1cd   : > { %v2052_v60 = vpop.xlane.xlu0 %824  ;;  %v872_v6 = vmul.f32 %v2013_v63, %v871_v52  ;;  %1559 = vrsqrt.f32 %v2050_v15  ;;  %1073 = vperm.xlu2 %1538, %v1055_v0   ;;  %v919_v34 = vmul.f32 %v2037_v50, %v918_v53  ;;  %v898_v48 = vmul.f32 %v1556_v8, %v2019_v3 }
 0x1ce   : > { %v886_v12 = vsel %vm2044_vm10, %v2007_v56, %v882_v46  ;;  %v909_v41 = vmul.f32 %v2054_v1, %v908_v10  ;;  %v892_v56 = vmul.f32 %v2005_v54, %v891_v4  ;;  %1561 = vrsqrt.f32 %v2052_v60  ;;  %1078 = vperm.xlu0 %1539, %v1056_v39  }
 0x1cf   : > { %v876_v20 = vsel %vm2067_vm13, %v2013_v63, %v872_v6  ;;  %v899_v45 = vmul.f32 %v1556_v8, %v898_v48  ;;  %v1010_v49 = vmin.f32 %v886_v12, 1e+08  ;;  %v920_v63 = vmul.f32 0.5, %v919_v34 }
 0x1d0   : > { %v910_v51 = vmul.f32 0.5, %v909_v41  ;;  %v1009_v53 = vmin.f32 %v876_v20, 1e+08  ;;  %v896_v43 = vsel %vm2093_vm2, %v2005_v54, %v892_v56  ;;  %vm904_vm4 = vweird.f32 %v1556_v8  ;;  %v1042_v54 = vld [vmem:[%s1762_s19 + $0x18] sm:$0xff] }
 0x1d1   : > { %v900_v46 = vmul.f32 0.5, %v899_v45  ;;  %vm914_vm5 = vweird.f32 %v2054_v1  ;;  %v1026_v36 = vmul.f32 %v1010_v49, %v1975_v18  ;;  %v921_v41 = vsub.f32 1.5, %v920_v63  ;;  %vm905_vm7 = vmor %vm903_vm3, %vm904_vm4  ;;  %v1041_v18 = vld [vmem:[%s1762_s19 + $0x10] sm:$0xff] }
 0x1d2   : > { %v2082_v40 = vpop.eup %1557  ;;  %v911_v6 = vsub.f32 1.5, %v910_v51  ;;  %v1025_v56 = vmul.f32 %v1009_v53, %v1969_v14  ;;  %vm2130_vm9 = vmor %vm913_vm0, %vm914_vm5  ;;  %v1011_v3 = vmin.f32 %v896_v43, 1e+08  ;;  %vm953_vm10 = vweird.f32 %v2041_v55 }
 0x1d3   : > { %v2085_v52 = vpop.eup %1559  ;;  %v948_v58 = vmul.f32 %v2082_v40, %v2041_v55  ;;  %v2089_v0 = vpop.xlane.xlu2 %839  ;;  %v901_v32 = vsub.f32 1.5, %v900_v46  ;;  %vm943_vm11 = vweird.f32 %v2050_v15  ;;  %vm933_vm12 = vweird.f32 %v2052_v60 }
 0x1d4   : > { %v938_v10 = vmul.f32 %v2085_v52, %v2050_v15  ;;  %1563 = vrsqrt.f32 %v2089_v0  ;;  %v2101_v11 = vpop.xlane.xlu1 %836  ;;  %v2113_v20 = vpop.eup %1561  ;;  %v912_v51 = vmul.f32 %v2054_v1, %v911_v6  ;;  %v1058_v6 = vmul.f32 %v1042_v54, %v1026_v36 }
 0x1d5   : > { %v2103_v12 = vpop.xlane.xlu0 %833  ;;  %v949_v34 = vmul.f32 %v2082_v40, %v948_v58  ;;  %1565 = vrsqrt.f32 %v2101_v11  ;;  %v902_v45 = vmul.f32 %v1556_v8, %v901_v32  ;;  %v928_v39 = vmul.f32 %v2113_v20, %v2052_v60 }
 0x1d6   : > { %v939_v48 = vmul.f32 %v2085_v52, %v938_v10  ;;  %1567 = vrsqrt.f32 %v2103_v12  ;;  %v922_v10 = vmul.f32 %v2037_v50, %v921_v41  ;;  %v1057_v2 = vmul.f32 %v1041_v18, %v1025_v56  ;;  %1088 = vperm.xlu2 %1538, %v1058_v6  }
 0x1d7   : > { %v906_v14 = vsel %vm905_vm7, %v1556_v8, %v902_v45  ;;  %v950_v53 = vmul.f32 0.5, %v949_v34  ;;  %v929_v4 = vmul.f32 %v2113_v20, %v928_v39  ;;  %v916_v8 = vsel %vm2130_vm9, %v2054_v1, %v912_v51 }
 0x1d8   : > { %v940_v63 = vmul.f32 0.5, %v939_v48  ;;  %v1012_v58 = vmin.f32 %v906_v14, 1e+08  ;;  %vm934_vm13 = vweird.f32 %v2113_v20  ;;  %1083 = vperm.xlu1 %1540, %v1057_v2   ;;  %v1027_v18 = vmul.f32 %v1011_v3, %v1967_v13 }
 0x1d9   : > { %v930_v34 = vmul.f32 0.5, %v929_v4  ;;  %v951_v36 = vsub.f32 1.5, %v950_v53  ;;  %v926_v14 = vsel %vm2159_vm14, %v2037_v50, %v922_v10  ;;  %vm954_vm15 = vweird.f32 %v2082_v40  ;;  %v1043_v53 = vld [vmem:[%s1762_s19 + $0x20] sm:$0xff]  ;;  %vm935_vm2 = vmor %vm933_vm12, %vm934_vm13 }
 0x1da   : > { %v2134_v46 = vpop.eup %1563  ;;  %v941_v41 = vsub.f32 1.5, %v940_v63  ;;  %v1028_v49 = vmul.f32 %v1012_v58, %v1973_v16  ;;  %vm944_vm0 = vweird.f32 %v2085_v52  ;;  %v1044_v63 = vld [vmem:[%s1762_s19 + $0x28] sm:$0xff]  ;;  %v1013_v16 = vmin.f32 %v916_v8, 1e+08  ;;  %vm2203_vm5 = vmor %vm953_vm10, %vm954_vm15  ;;  %v2284_v8 = vld [vmem:[%s1767_s30 + $0x50] sm:$0xff] }
 0x1db   : > { %v2140_v32 = vpop.eup %1565  ;;  %v978_v43 = vmul.f32 %v2134_v46, %v2089_v0  ;;  %v931_v56 = vsub.f32 1.5, %v930_v34  ;;  %v952_v3 = vmul.f32 %v2082_v40, %v951_v36  ;;  %v1059_v2 = vmul.f32 %v1043_v53, %v1027_v18  ;;  %vm2193_vm3 = vmor %vm943_vm11, %vm944_vm0 }
 0x1dc   : > { %v2148_v48 = vpop.eup %1567  ;;  %v968_v45 = vmul.f32 %v2140_v32, %v2101_v11  ;;  %v2153_v1 = vpop.xlane.xlu1 %845  ;;  %v942_v50 = vmul.f32 %v2085_v52, %v941_v41  ;;  %v1060_v34 = vmul.f32 %v1044_v63, %v1028_v49  ;;  %vm963_vm6 = vweird.f32 %v2103_v12 }
 0x1dd   : > { %v958_v51 = vmul.f32 %v2148_v48, %v2103_v12  ;;  %v2165_v39 = vpop.xlane.xlu0 %842  ;;  %v932_v4 = vmul.f32 %v2113_v20, %v931_v56  ;;  %v979_v6 = vmul.f32 %v2134_v46, %v978_v43  ;;  %1569 = vrsqrt.f32 %v2153_v1 }
 0x1de   : > { %v969_v62 = vmul.f32 %v2140_v32, %v968_v45  ;;  %1571 = vrsqrt.f32 %v2165_v39  ;;  %v1014_v43 = vmin.f32 %v926_v14, 1e+08  ;;  %vm964_vm4 = vweird.f32 %v2148_v48  ;;  %1093 = vperm.xlu2 %1538, %v1059_v2  }
 0x1df   : > { %v959_v13 = vmul.f32 %v2148_v48, %v958_v51  ;;  %v936_v58 = vsel %vm935_vm2, %v2113_v20, %v932_v4  ;;  %v980_v60 = vmul.f32 0.5, %v979_v6  ;;  %v1047_v20 = vld [vmem:[%s1762_s19 + $0x40] sm:$0xff]  ;;  %v956_v51 = vsel %vm2203_vm5, %v2082_v40, %v952_v3  ;;  %vm965_vm7 = vmor %vm963_vm6, %vm964_vm4  ;;  %v1046_v6 = vld [vmem:[%s1762_s19 + $0x38] sm:$0xff] }
 0x1e0   : > { %v1015_v36 = vmin.f32 %v936_v58, 1e+08  ;;  %v970_v41 = vmul.f32 0.5, %v969_v62  ;;  %1098 = vperm.xlu1 %1540, %v1060_v34   ;;  %v946_v55 = vsel %vm2193_vm3, %v2085_v52, %v942_v50  ;;  %v1029_v49 = vmul.f32 %v1013_v16, %v1983_v24  ;;  %v1045_v62 = vld [vmem:[%s1762_s19 + $0x30] sm:$0xff] }
 0x1e1   : > { %v960_v10 = vmul.f32 0.5, %v959_v13  ;;  %v1030_v53 = vmul.f32 %v1014_v43, %v1981_v23  ;;  %v981_v40 = vsub.f32 1.5, %v980_v60  ;;  %vm973_vm8 = vweird.f32 %v2101_v11  ;;  %v1050_v23 = vld [vmem:[%s1762_s19 + $0x58] sm:$0xff] }
 0x1e2   : > { %v1031_v15 = vmul.f32 %v1015_v36, %v1979_v22  ;;  %v971_v12 = vsub.f32 1.5, %v970_v41  ;;  %vm974_vm9 = vweird.f32 %v2140_v32  ;;  %v1017_v16 = vmin.f32 %v956_v51, 1e+08 }
 0x1e3   : > { %v961_v45 = vsub.f32 1.5, %v960_v10  ;;  %v2209_v56 = vpop.eup %1569  ;;  %v1016_v3 = vmin.f32 %v946_v55, 1e+08  ;;  %v1061_v58 = vmul.f32 %v1045_v62, %v1029_v49  ;;  %v982_v43 = vmul.f32 %v2134_v46, %v981_v40  ;;  %vm2239_vm12 = vmor %vm973_vm8, %vm974_vm9  ;;  %v1052_v40 = vld [vmem:[%s1762_s19 + $0x68] sm:$0xff] }
 0x1e4   : > { %v1572_v14 = vpop.eup %1571  ;;  %v998_v22 = vmul.f32 %v2209_v56, %v2153_v1  ;;  %v1063_v63 = vmul.f32 %v1047_v20, %v1031_v15  ;;  %v972_v10 = vmul.f32 %v2140_v32, %v971_v12  ;;  %vm983_vm10 = vweird.f32 %v2089_v0  ;;  %v1048_v20 = vld [vmem:[%s1762_s19 + $0x48] sm:$0xff] }
 0x1e5   : > { %v962_v18 = vmul.f32 %v2148_v48, %v961_v45  ;;  %v988_v52 = vmul.f32 %v1572_v14, %v2165_v39  ;;  %vm984_vm11 = vweird.f32 %v2134_v46  ;;  %vm994_vm13 = vweird.f32 %v1572_v14 }
 0x1e6   : > { %v999_v13 = vmul.f32 %v2209_v56, %v998_v22  ;;  %1113 = vperm.xlu0 %1539, %v1063_v63   ;;  %1103 = vperm.xlu2 %1538, %v1061_v58   ;;  %v1032_v60 = vmul.f32 %v1016_v3, %v1989_v27  ;;  %vm2244_vm14 = vmor %vm983_vm10, %vm984_vm11  ;;  %v976_v11 = vsel %vm2239_vm12, %v2140_v32, %v972_v10  ;;  %vm993_vm15 = vweird.f32 %v2165_v39  ;;  %v1049_v27 = vld [vmem:[%s1762_s19 + $0x50] sm:$0xff]  ;;  %v1192_v58 = vld [vmem:[%s1767_s30 + $0x48] sm:$0xff] }
 0x1e7   : > { %v966_v4 = vsel %vm965_vm7, %v2148_v48, %v962_v18  ;;  %v989_v50 = vmul.f32 %v1572_v14, %v988_v52  ;;  %v1062_v48 = vmul.f32 %v1046_v6, %v1030_v53  ;;  %v1033_v54 = vmul.f32 %v1017_v16, %v1987_v26  ;;  %vm995_vm3 = vmor %vm993_vm15, %vm994_vm13  ;;  %v1053_v39 = vld [vmem:[%s1762_s19 + $0x70] sm:$0xff]  ;;  %v1183_v6 = vld [vmem:[%s1767_s30] sm:$0xff] }
 0x1e8   : > { %v1018_v24 = vmin.f32 %v966_v4, 1e+08  ;;  %v1000_v2 = vmul.f32 0.5, %v999_v13  ;;  %v986_v15 = vsel %vm2244_vm14, %v2134_v46, %v982_v43  ;;  %vm1003_vm0 = vweird.f32 %v2153_v1  ;;  %v1186_v13 = vld [vmem:[%s1767_s30 + $0x18] sm:$0xff]  ;;  %v1187_v16 = vld [vmem:[%s1767_s30 + $0x20] sm:$0xff]  ;;  %v1189_v3 = vld [vmem:[%s1767_s30 + $0x30] sm:$0xff] }
 0x1e9   : > { %v990_v36 = vmul.f32 0.5, %v989_v50  ;;  %1108 = vperm.xlu1 %1540, %v1062_v48   ;;  %vm1004_vm2 = vweird.f32 %v2209_v56  ;;  %v1019_v32 = vmin.f32 %v976_v11, 1e+08  ;;  %v1064_v26 = vmul.f32 %v1048_v20, %v1032_v60  ;;  %v1184_v50 = vld [vmem:[%s1767_s30 + $0x8] sm:$0xff]  ;;  %v1191_v43 = vld [vmem:[%s1767_s30 + $0x40] sm:$0xff] }
 0x1ea   : > { %v1034_v34 = vmul.f32 %v1018_v24, %v1985_v25  ;;  %v1001_v45 = vsub.f32 1.5, %v1000_v2  ;;  %v1020_v18 = vmin.f32 %v986_v15, 1e+08  ;;  %v1065_v12 = vmul.f32 %v1049_v27, %v1033_v54  ;;  %vm1005_vm4 = vmor %vm1003_vm0, %vm1004_vm2  ;;  %v1188_v10 = vld [vmem:[%s1767_s30 + $0x28] sm:$0xff]  ;;  %v1198_v2 = vld [vmem:[%s1767_s30 + $0x78] sm:$0xff] }
 0x1eb   : > { %v991_v25 = vsub.f32 1.5, %v990_v36  ;;  %v1035_v22 = vmul.f32 %v1019_v32, %v1995_v31  ;;  %v2287_v36 = vld [vmem:[%s1767_s30 + $0x58] sm:$0xff] }
 0x1ec   : > { %v1066_v41 = vmul.f32 %v1050_v23, %v1034_v34  ;;  %v1002_v49 = vmul.f32 %v2209_v56, %v1001_v45  ;;  %v1036_v53 = vmul.f32 %v1020_v18, %v1993_v30  ;;  %v1054_v30 = vld [vmem:[%s1762_s19 + $0x78] sm:$0xff]  ;;  %v1185_v23 = vld [vmem:[%s1767_s30 + $0x10] sm:$0xff] }
 0x1ed   : > { %v992_v51 = vmul.f32 %v1572_v14, %v991_v25  ;;  %v1190_v34 = vld [vmem:[%s1767_s30 + $0x38] sm:$0xff]  ;;  %v2293_v25 = vld [vmem:[%s1767_s30 + $0x70] sm:$0xff] }
 0x1ee   : > { %1128 = vperm.xlu0 %1539, %v1066_v41   ;;  %1118 = vperm.xlu2 %1538, %v1064_v26   ;;  %v1006_v62 = vsel %vm1005_vm4, %v2209_v56, %v1002_v49  ;;  %v2290_v41 = vld [vmem:[%s1767_s30 + $0x68] sm:$0xff] }
 0x1ef   : > { %v996_v55 = vsel %vm995_vm3, %v1572_v14, %v992_v51  ;;  %v1051_v14 = vld [vmem:[%s1762_s19 + $0x60] sm:$0xff]  ;;  %v1022_v4 = vmin.f32 %v1006_v62, 1e+08 }
 0x1f0   : > { %v1021_v46 = vmin.f32 %v996_v55, 1e+08  ;;  %v1067_v52 = vmul.f32 %v1051_v14, %v1035_v22 }
 0x1f1   : > { %1123 = vperm.xlu1 %1540, %v1065_v12   ;;  %v1038_v31 = vmul.f32 %v1022_v4, %v1997_v37  ;;  %v1195_v37 = vld [vmem:[%s1767_s30 + $0x60] sm:$0xff] }
 0x1f2   : > { %v1037_v1 = vmul.f32 %v1021_v46, %v1991_v28  ;;  %v1068_v28 = vmul.f32 %v1052_v40, %v1036_v53 }
 0x1f3   : > { %v1070_v56 = vmul.f32 %v1054_v30, %v1038_v31 }
 0x1f4   : > { %v1069_v63 = vmul.f32 %v1053_v39, %v1037_v1 }
 0x1f6   : > { %1143 = vperm.xlu0 %1539, %v1069_v63   ;;  %1133 = vperm.xlu2 %1538, %v1067_v52  }
 0x1f9   : > { %1138 = vperm.xlu1 %1540, %v1068_v28  }
 0x1fe   : > { %1148 = vperm.xlu2 %1538, %v1070_v56  }
 0x227   : > { %v1074_v24 = vpop.permute.xlu2 %1073 }
 0x228   : > { %v1151_v48 = vmul.f32 %v1074_v24, %v1846_v38 }
 0x22a   : > { %1167 = vst.msk [vmem:[%s1772_s12] sm:$0xff] %vm666_vm1, %v1151_v48  ;;  %v1199_v60 = vadd.f32 %v1183_v6, %v1151_v48 }
 0x22c   : > { %1215 = vst.msk [vmem:[%s1777_s15] sm:$0xff] %vm666_vm1, %v1199_v60 }
 0x230   : > { %v1089_v0 = vpop.permute.xlu2 %1088 }
 0x231   : > { %v1154_v38 = vmul.f32 %v1089_v0, %v1854_v44 }
 0x233   : > { %1170 = vst.msk [vmem:[%s1772_s12 + $0x18] sm:$0xff] %vm666_vm1, %v1154_v38  ;;  %v1202_v11 = vadd.f32 %v1186_v13, %v1154_v38 }
 0x235   : > { %1218 = vst.msk [vmem:[%s1777_s15 + $0x18] sm:$0xff] %vm666_vm1, %v1202_v11 }
 0x238   : > { %v1094_v45 = vpop.permute.xlu2 %1093 }
 0x239   : > { %v1155_v20 = vmul.f32 %v1094_v45, %v1839_v33 }
 0x23b   : > { %1171 = vst.msk [vmem:[%s1772_s12 + $0x20] sm:$0xff] %vm666_vm1, %v1155_v20  ;;  %v1203_v54 = vadd.f32 %v1187_v16, %v1155_v20 }
 0x23d   : > { %1219 = vst.msk [vmem:[%s1777_s15 + $0x20] sm:$0xff] %vm666_vm1, %v1203_v54 }
 0x240   : > { %v1104_v15 = vpop.permute.xlu2 %1103  ;;  %v1079_v44 = vpop.permute.xlu0 %1078 }
 0x241   : > { %v1157_v51 = vmul.f32 %v1104_v15, %v1875_v61  ;;  %v1152_v27 = vmul.f32 %v1079_v44, %v1858_v47 }
 0x243   : > { %1173 = vst.msk [vmem:[%s1772_s12 + $0x30] sm:$0xff] %vm666_vm1, %v1157_v51  ;;  %v1205_v32 = vadd.f32 %v1189_v3, %v1157_v51  ;;  %v1200_v55 = vadd.f32 %v1184_v50, %v1152_v27 }
 0x244   : > { %1168 = vst.msk [vmem:[%s1772_s12 + $0x8] sm:$0xff] %vm666_vm1, %v1152_v27 }
 0x245   : > { %1216 = vst.msk [vmem:[%s1777_s15 + $0x8] sm:$0xff] %vm666_vm1, %v1200_v55 }
 0x246   : > { %1221 = vst.msk [vmem:[%s1777_s15 + $0x30] sm:$0xff] %vm666_vm1, %v1205_v32 }
 0x248   : > { %v1119_v33 = vpop.permute.xlu2 %1118 }
 0x249   : > { %v1160_v26 = vmul.f32 %v1119_v33, %v1890_v9 }
 0x24a   : > { %v1084_v61 = vpop.permute.xlu1 %1083 }
 0x24b   : > { %v1153_v18 = vmul.f32 %v1084_v61, %v1842_v35  ;;  %1176 = vst.msk [vmem:[%s1772_s12 + $0x48] sm:$0xff] %vm666_vm1, %v1160_v26  ;;  %v1208_v47 = vadd.f32 %v1192_v58, %v1160_v26 }
 0x24d   : > { %1169 = vst.msk [vmem:[%s1772_s12 + $0x10] sm:$0xff] %vm666_vm1, %v1153_v18  ;;  %v1201_v49 = vadd.f32 %v1185_v23, %v1153_v18 }
 0x24e   : > { %1224 = vst.msk [vmem:[%s1777_s15 + $0x48] sm:$0xff] %vm666_vm1, %v1208_v47 }
 0x24f   : > { %1217 = vst.msk [vmem:[%s1777_s15 + $0x10] sm:$0xff] %vm666_vm1, %v1201_v49 }
 0x250   : > { %v1134_v46 = vpop.permute.xlu2 %1133 }
 0x251   : > { %v1163_v12 = vmul.f32 %v1134_v46, %v1905_v21 }
 0x252   : > { %v1099_v9 = vpop.permute.xlu1 %1098 }
 0x253   : > { %v1156_v35 = vmul.f32 %v1099_v9, %v1851_v42  ;;  %1179 = vst.msk [vmem:[%s1772_s12 + $0x60] sm:$0xff] %vm666_vm1, %v1163_v12  ;;  %v1211_v39 = vadd.f32 %v1195_v37, %v1163_v12 }
 0x255   : > { %1172 = vst.msk [vmem:[%s1772_s12 + $0x28] sm:$0xff] %vm666_vm1, %v1156_v35  ;;  %v1204_v1 = vadd.f32 %v1188_v10, %v1156_v35 }
 0x256   : > { %1227 = vst.msk [vmem:[%s1777_s15 + $0x60] sm:$0xff] %vm666_vm1, %v1211_v39 }
 0x257   : > { %1220 = vst.msk [vmem:[%s1777_s15 + $0x28] sm:$0xff] %vm666_vm1, %v1204_v1 }
 0x258   : > { %v1114_v22 = vpop.permute.xlu0 %1113  ;;  %v1149_v21 = vpop.permute.xlu2 %1148 }
 0x259   : > { %v1159_v62 = vmul.f32 %v1114_v22, %v1869_v57  ;;  %v1166_v14 = vmul.f32 %v1149_v21, %v1914_v29 }
 0x25b   : > { %1175 = vst.msk [vmem:[%s1772_s12 + $0x40] sm:$0xff] %vm666_vm1, %v1159_v62  ;;  %v1207_v42 = vadd.f32 %v1191_v43, %v1159_v62  ;;  %v1109_v53 = vpop.permute.xlu1 %1108  ;;  %v1214_v57 = vadd.f32 %v1198_v2, %v1166_v14 }
 0x25c   : > { %v1158_v63 = vmul.f32 %v1109_v53, %v1872_v59  ;;  %1182 = vst.msk [vmem:[%s1772_s12 + $0x78] sm:$0xff] %vm666_vm1, %v1166_v14 }
 0x25d   : > { %1223 = vst.msk [vmem:[%s1777_s15 + $0x40] sm:$0xff] %vm666_vm1, %v1207_v42 }
 0x25e   : > { %1174 = vst.msk [vmem:[%s1772_s12 + $0x38] sm:$0xff] %vm666_vm1, %v1158_v63  ;;  %v1206_v40 = vadd.f32 %v1190_v34, %v1158_v63 }
 0x25f   : > { %1230 = vst.msk [vmem:[%s1777_s15 + $0x78] sm:$0xff] %vm666_vm1, %v1214_v57 }
 0x260   : > { %v1129_v4 = vpop.permute.xlu0 %1128  ;;  %1222 = vst.msk [vmem:[%s1777_s15 + $0x38] sm:$0xff] %vm666_vm1, %v1206_v40 }
 0x261   : > { %v1162_v29 = vmul.f32 %v1129_v4, %v1884_v5 }
 0x263   : > { %1178 = vst.msk [vmem:[%s1772_s12 + $0x58] sm:$0xff] %vm666_vm1, %v1162_v29  ;;  %v1210_v59 = vadd.f32 %v2287_v36, %v1162_v29  ;;  %v1124_v52 = vpop.permute.xlu1 %1123 }
 0x264   : > { %v1161_v28 = vmul.f32 %v1124_v52, %v1887_v7 }
 0x265   : > { %1226 = vst.msk [vmem:[%s1777_s15 + $0x58] sm:$0xff] %vm666_vm1, %v1210_v59 }
 0x266   : > { %1177 = vst.msk [vmem:[%s1772_s12 + $0x50] sm:$0xff] %vm666_vm1, %v1161_v28  ;;  %v1209_v31 = vadd.f32 %v2284_v8, %v1161_v28 }
 0x268   : > { %v1144_v30 = vpop.permute.xlu0 %1143  ;;  %1225 = vst.msk [vmem:[%s1777_s15 + $0x50] sm:$0xff] %vm666_vm1, %v1209_v31 }
 0x269   : > { %v1165_v5 = vmul.f32 %v1144_v30, %v1899_v17 }
 0x26b   : > { %1181 = vst.msk [vmem:[%s1772_s12 + $0x70] sm:$0xff] %vm666_vm1, %v1165_v5  ;;  %v1213_v56 = vadd.f32 %v2293_v25, %v1165_v5  ;;  %v1139_v6 = vpop.permute.xlu1 %1138 }
 0x26c   : > { %v1164_v24 = vmul.f32 %v1139_v6, %v1902_v19 }
 0x26d   : > { %1229 = vst.msk [vmem:[%s1777_s15 + $0x70] sm:$0xff] %vm666_vm1, %v1213_v56 }
 0x26e   : > { %1180 = vst.msk [vmem:[%s1772_s12 + $0x68] sm:$0xff] %vm666_vm1, %v1164_v24  ;;  %v1212_v7 = vadd.f32 %v2290_v41, %v1164_v24 }
 0x270   : > { %1228 = vst.msk [vmem:[%s1777_s15 + $0x68] sm:$0xff] %vm666_vm1, %v1212_v7 }
 0x271 PF: > { %s17_s27 = sadd.s32 1, %s1627_s27   ;;  %s2428_s21 = smov %s1607_s22 }
 0x272   : > { %p14_p0 = scmp.ge.s32.totalorder %s17_s27, 6   ;;  %s2429_s22 = smov %s1717_s10 }
 0x273   : > { %s2430_s23 = smov %s1619_s25  ;;  %s2431_s24 = smov %s1623_s26 }
 0x274   : > { %s2432_s25 = smov %s2435_s28  ;;  %s2433_s26 = smov %s2439_s29 }
 0x275   :  { %16 = sbr.rel (!%p14_p0) target bundleno = 6 (0x6), region = 148 }

</bundles_post_ra>
